<compile_context>
chip_gen: v5e
topology: v5e:2x2
jax: 0.10.0
libtpu: 0.0.40
codegen_flags: <defaults>
</compile_context>

<pallas_src>
import functools

import numpy as np

import jax
import jax.numpy as jnp
from jax import lax
from jax.experimental import pallas as pl
from jax.experimental.pallas import tpu as pltpu


# ----------------------------------------------------------------------------
# Fused forward kernel: conv1 (single matmul) + conv2/conv3 (3 matmuls each,
# per kernel row) + fc, all in VMEM, bf16 operands / f32 accumulation.
# ----------------------------------------------------------------------------
def _dqn_kernel(x_ref, wb1_ref, b1_ref, wb2_ref, b2_ref, wb3_ref, b3_ref,
                wfc_ref, bfc_ref, out_ref, *, bc, n2, n3):
    f32 = jnp.float32
    bf16 = jnp.bfloat16
    m2, m3 = n2 * bc, n3 * bc

    # conv1: kh folded into K -> one [18*bc, 768] x [768, 256] MXU matmul.
    y1 = jnp.dot(x_ref[...], wb1_ref[...], preferred_element_type=f32)
    y1 = jnp.maximum(y1 + b1_ref[...], 0.0).astype(bf16)

    def conv_block(y, wb_ref, b_ref, m):
        # X_kh is a contiguous row block of the previous activation
        # (kh-major, batch-minor row ordering).
        acc = jnp.dot(y[0:m, :], wb_ref[0], preferred_element_type=f32)
        for kh in range(1, 3):
            acc = acc + jnp.dot(y[kh * m:(kh + 1) * m, :], wb_ref[kh],
                                preferred_element_type=f32)
        return jnp.maximum(acc + b_ref[...], 0.0).astype(bf16)

    y2 = conv_block(y1, wb2_ref, b2_ref, m2)
    y3 = conv_block(y2, wb3_ref, b3_ref, m3)

    # fc1: torch's NCHW flatten is folded into wfc (one K=128 matmul per h).
    q = (jnp.dot(y3[0:bc, :], wfc_ref[0], preferred_element_type=f32)
         + jnp.dot(y3[bc:2 * bc, :], wfc_ref[1], preferred_element_type=f32)
         + bfc_ref[...])
    out_ref[...] = q.astype(out_ref.dtype)


def _pick_chunk(batch):
    """Samples per grid step: >=2 grid steps once batch>=2 (so v7x megacore
    can shard the 'parallel' axis), rounded up to a sublane multiple, capped
    at 256 so double-buffered blocks stay well inside VMEM (~25 MiB)."""
    if batch <= 1:
        return 1
    bc = -(-batch // 2)
    if bc >= 8:
        bc = -(-bc // 8) * 8
    return min(bc, 256)


@functools.partial(jax.jit, static_argnames=("n_actions",))
def dqn_forward(prepped, state_t, *, n_actions):
    """state_t: [B, 4, H, W] float32 -> qvalues: [B, n_actions] float32."""
    B, C0, H, W = state_t.shape
    OH1, OW1 = (H - 3) // 3 + 1, (W - 3) // 3 + 1
    OH2, OW2 = (OH1 - 3) // 3 + 1, (OW1 - 3) // 3 + 1
    OH3, OW3 = (OH2 - 3) // 3 + 1, (OW2 - 3) // 3 + 1
    assert OH3 == 2 and OW3 == 2, "DQNAgent requires a 2x2 final spatial map"

    # Output-row orders, back to front (kh-major so every layer's X_kh is a
    # contiguous row block of the previous activation).
    ord3 = list(range(OH3))                                   # 2 rows
    ord2 = [3 * o + kh for kh in range(3) for o in ord3]      # 6 rows
    ord1 = [3 * o + kh for kh in range(3) for o in ord2]      # 18 rows
    n1, n2, n3 = len(ord1), len(ord2), len(ord3)

    k1 = 3 * OW1 * C0                                         # 252
    K1p = prepped["wb1"].shape[0]                             # 768 (3*k1 padded)
    npad = prepped["bfc"].shape[-1]

    bc = _pick_chunk(B)
    Bp = -(-B // bc) * bc
    nc = Bp // bc

    # Pack the input (bf16): NCHW -> NHWC, crop, group image rows into
    # output-row triples so kh falls into the lane dim, gather the 18 needed
    # triples, pad lanes to 768 / batch to Bp, reorder rows kh/row-major,
    # batch-minor per chunk.
    # TODO(synk): the 18-triple gather could move into Pallas via
    # PrefetchScalarGridSpec so the kernel DMAs only the needed rows from HBM.
    x = state_t.astype(jnp.bfloat16)
    xw = x[:, :, :3 * OH1, :3 * OW1]                          # [B, C, 3*OH1, 3*OW1]
    x_nhwc = jnp.transpose(xw, (0, 2, 3, 1))                  # [B, 3*OH1, 3*OW1, C]
    x3 = x_nhwc.reshape(B, OH1, 3 * k1)                       # lane = kh*k1 + w*C + c
    xsel = x3[:, jnp.asarray(ord1, jnp.int32), :]             # [B, 18, 3*k1]
    xsel = jnp.pad(xsel, ((0, Bp - B), (0, 0), (0, K1p - 3 * k1)))
    xg = xsel.reshape(nc, bc, n1, K1p)
    xg = jnp.transpose(xg, (0, 2, 1, 3)).reshape(nc, n1 * bc, K1p)

    kernel = functools.partial(_dqn_kernel, bc=bc, n2=n2, n3=n3)

    out = pl.pallas_call(
        kernel,
        out_shape=jax.ShapeDtypeStruct((nc, bc, npad), jnp.float32),
        grid=(nc,),
        in_specs=[
            pl.BlockSpec((None, n1 * bc, K1p), lambda c: (c, 0, 0)),
            pl.BlockSpec(prepped["wb1"].shape, lambda c: (0, 0)),
            pl.BlockSpec(prepped["b1"].shape, lambda c: (0, 0)),
            pl.BlockSpec(prepped["wb2"].shape, lambda c: (0, 0, 0)),
            pl.BlockSpec(prepped["b2"].shape, lambda c: (0, 0)),
            pl.BlockSpec(prepped["wb3"].shape, lambda c: (0, 0, 0)),
            pl.BlockSpec(prepped["b3"].shape, lambda c: (0, 0)),
            pl.BlockSpec(prepped["wfc"].shape, lambda c: (0, 0, 0)),
            pl.BlockSpec(prepped["bfc"].shape, lambda c: (0, 0)),
        ],
        out_specs=pl.BlockSpec((None, bc, npad), lambda c: (c, 0, 0)),
        compiler_params=pltpu.CompilerParams(
            dimension_semantics=("parallel",),
            vmem_limit_bytes=48 * 1024 * 1024),
    )(xg, prepped["wb1"], prepped["b1"], prepped["wb2"], prepped["b2"],
      prepped["wb3"], prepped["b3"], prepped["wfc"], prepped["bfc"])

    return out.reshape(Bp, npad)[:B, :n_actions]


# ----------------------------------------------------------------------------
# One-time parameter packing (host side, numpy): conv weights -> lane-dense
# Wbig matrices (conv1's kh merged into K), biases -> zero-padded tiled lane
# rows, fc weights -> (h, padded-K, padded-N) with the torch NCHW-flatten
# permutation folded in.  Weights bf16, biases f32.
# ----------------------------------------------------------------------------
def prepare_params(params, state_shape):
    _, H, W = state_shape
    OH1, OW1 = (H - 3) // 3 + 1, (W - 3) // 3 + 1
    OH2, OW2 = (OH1 - 3) // 3 + 1, (OW1 - 3) // 3 + 1
    OH3, OW3 = (OH2 - 3) // 3 + 1, (OW2 - 3) // 3 + 1
    assert OH3 == 2 and OW3 == 2
    c0 = int(params["conv1_w"].shape[1])
    c1 = int(params["conv1_w"].shape[0])
    c2 = int(params["conv2_w"].shape[0])
    c3 = int(params["conv3_w"].shape[0])
    n_actions = int(params["fc1_b"].shape[0])
    assert int(params["fc1_w"].shape[1]) == OH3 * OW3 * c3

    def rup(x, m):
        return ((x + m - 1) // m) * m

    k1 = 3 * OW1 * c0                       # 252
    K1p = rup(3 * k1, 128)                  # 768
    N1p = rup(OW1 * c1, 128)                # 256
    N2p = rup(OW2 * c2, 128)                # 128
    N3p = rup(OW3 * c3, 128)                # 128
    npad = rup(n_actions, 128)              # 128

    def build_wbig(w, ow, k_pad, n_pad):
        w = np.asarray(w, np.float32)       # [Cout, Cin, 3, 3]
        cout, cin = w.shape[0], w.shape[1]
        wb = np.zeros((3, k_pad, n_pad), np.float32)
        for kh in range(3):
            for kw in range(3):
                blk = w[:, :, kh, kw].T     # [Cin, Cout]
                for o in range(ow):
                    r0 = (3 * o + kw) * cin
                    wb[kh, r0:r0 + cin, o * cout:(o + 1) * cout] = blk
        return wb

    # conv1: fold kh into a single K dimension (one MXU sweep), pad K to 768.
    wb1_kh = build_wbig(params["conv1_w"], OW1, k1, N1p)       # [3, 252, 256]
    wb1 = np.zeros((K1p, N1p), np.float32)
    wb1[:3 * k1, :] = wb1_kh.reshape(3 * k1, N1p)

    wb2 = build_wbig(params["conv2_w"], OW2, N1p, N2p)         # [3, 256, 128]
    wb3 = build_wbig(params["conv3_w"], OW3, N2p, N3p)         # [3, 128, 128]

    def tile_bias(b, ow, n_pad):
        b = np.asarray(b, np.float32)
        out = np.zeros((1, n_pad), np.float32)                 # padded lanes stay 0
        out[0, :ow * b.shape[0]] = np.tile(b, ow)
        return jnp.asarray(out)

    fcw = np.asarray(params["fc1_w"], np.float32)              # [n_actions, 2*2*c3]
    wfc = np.zeros((OH3, N3p, npad), np.float32)
    for h in range(OH3):
        for w_ in range(OW3):
            for c in range(c3):
                wfc[h, w_ * c3 + c, :n_actions] = fcw[:, c * OH3 * OW3 + h * OW3 + w_]
    bfc = np.zeros((1, npad), np.float32)
    bfc[0, :n_actions] = np.asarray(params["fc1_b"], np.float32)

    bf16 = jnp.bfloat16
    return {
        "wb1": jnp.asarray(wb1, bf16),
        "b1": tile_bias(params["conv1_b"], OW1, N1p),
        "wb2": jnp.asarray(wb2, bf16),
        "b2": tile_bias(params["conv2_b"], OW2, N2p),
        "wb3": jnp.asarray(wb3, bf16),
        "b3": tile_bias(params["conv3_b"], OW3, N3p),
        "wfc": jnp.asarray(wfc, bf16),
        "bfc": jnp.asarray(bfc),
    }


def init_params(key, n_actions):
    """Deterministic synthetic init, PyTorch conventions/shapes."""
    ks = jax.random.split(key, 8)

    def uni(k, shape, fan_in):
        bound = 1.0 / float(np.sqrt(fan_in))
        return jax.random.uniform(k, shape, jnp.float32, -bound, bound)

    return {
        "conv1_w": uni(ks[0], (8, 4, 3, 3), 4 * 9),
        "conv1_b": uni(ks[1], (8,), 4 * 9),
        "conv2_w": uni(ks[2], (16, 8, 3, 3), 8 * 9),
        "conv2_b": uni(ks[3], (16,), 8 * 9),
        "conv3_w": uni(ks[4], (32, 16, 3, 3), 16 * 9),
        "conv3_b": uni(ks[5], (32,), 16 * 9),
        "fc1_w": uni(ks[6], (n_actions, 2 * 2 * 32), 128),   # nn.Linear [out, in]
        "fc1_b": uni(ks[7], (n_actions,), 128),
    }


def _reference_forward(params, state_t):
    """Pure-JAX f32 reference (mirrors the torch module) for a numerical check."""
    dn = ("NCHW", "OIHW", "NCHW")
    x = state_t
    for i in (1, 2, 3):
        w, b = params[f"conv{i}_w"], params[f"conv{i}_b"]
        x = lax.conv_general_dilated(x, w, (3, 3), "VALID", dimension_numbers=dn,
                                     precision=lax.Precision.HIGHEST)
        x = jnp.maximum(x + b[None, :, None, None], 0.0)
    x = x.reshape(x.shape[0], -1)                     # NCHW flatten == torch .view
    return jnp.dot(x, params["fc1_w"].T,
                   precision=lax.Precision.HIGHEST) + params["fc1_b"]


# TODO(synk): sample_actions / get_qvalues are host-side numpy epsilon-greedy
# glue around forward(); they are not TPU kernels and are left to the caller.

if __name__ == "__main__":
    key = jax.random.PRNGKey(0)
    k_param, k_state = jax.random.split(key)

    n_actions = 6
    batch = 2
    # spatial 64 -> 21 -> 7 -> 2 under three conv(k=3, s=3), matching Linear(2*2*32).
    state_shape = (4, 64, 64)
    state_t = jax.random.uniform(k_state, (batch,) + state_shape, dtype=jnp.float32)

    params = init_params(k_param, n_actions)
    prepped = prepare_params(params, state_shape)

    qvalues = dqn_forward(prepped, state_t, n_actions=n_actions)
    qvalues = jax.block_until_ready(qvalues)

    assert qvalues.shape == (batch, n_actions), qvalues.shape
    assert qvalues.dtype == jnp.float32

    q_ref = _reference_forward(params, state_t)
    err = float(jnp.max(jnp.abs(qvalues - q_ref)))
    # bf16 activations/weights with f32 accumulation vs. f32 reference.
    assert err < 3e-2, f"mismatch vs pure-JAX reference: max abs err = {err}"
    print("KERNEL_OK")
</pallas_src>

<mosaic_0001>
module attributes {stable_mosaic.version = 11 : i64} {
  func.func @_dqn_kernel(%arg0: i32, %arg1: memref<1x18x768xbf16, #tpu.memory_space<vmem>>, %arg2: memref<768x256xbf16, #tpu.memory_space<vmem>>, %arg3: memref<1x256xf32, #tpu.memory_space<vmem>>, %arg4: memref<3x256x128xbf16, #tpu.memory_space<vmem>>, %arg5: memref<1x128xf32, #tpu.memory_space<vmem>>, %arg6: memref<3x128x128xbf16, #tpu.memory_space<vmem>>, %arg7: memref<1x128xf32, #tpu.memory_space<vmem>>, %arg8: memref<2x128x128xbf16, #tpu.memory_space<vmem>>, %arg9: memref<1x128xf32, #tpu.memory_space<vmem>>, %arg10: memref<1x1x128xf32, #tpu.memory_space<vmem>>) attributes {dimension_semantics = [#tpu.dimension_semantics<parallel>], iteration_bounds = array<i64: 2>, scalar_prefetch = 0 : i64, scratch_operands = 0 : i64, tpu.core_type = #tpu.core_type<tc>, window_params = [{transform_indices = @transform_0, window_bounds = array<i64: 1, 18, 768>}, {pipeline_mode = #tpu.pipeline_mode<synchronous>, transform_indices = @transform_1, window_bounds = array<i64: 768, 256>}, {pipeline_mode = #tpu.pipeline_mode<synchronous>, transform_indices = @transform_2, window_bounds = array<i64: 1, 256>}, {pipeline_mode = #tpu.pipeline_mode<synchronous>, transform_indices = @transform_3, window_bounds = array<i64: 3, 256, 128>}, {pipeline_mode = #tpu.pipeline_mode<synchronous>, transform_indices = @transform_4, window_bounds = array<i64: 1, 128>}, {pipeline_mode = #tpu.pipeline_mode<synchronous>, transform_indices = @transform_5, window_bounds = array<i64: 3, 128, 128>}, {pipeline_mode = #tpu.pipeline_mode<synchronous>, transform_indices = @transform_6, window_bounds = array<i64: 1, 128>}, {pipeline_mode = #tpu.pipeline_mode<synchronous>, transform_indices = @transform_7, window_bounds = array<i64: 2, 128, 128>}, {pipeline_mode = #tpu.pipeline_mode<synchronous>, transform_indices = @transform_8, window_bounds = array<i64: 1, 128>}, {transform_indices = @transform_9, window_bounds = array<i64: 1, 1, 128>}]} {
    %c0 = arith.constant 0 : index
    %c0_0 = arith.constant 0 : index
    %c0_1 = arith.constant 0 : index
    %0 = vector.load %arg1[%c0, %c0_0, %c0_1] : memref<1x18x768xbf16, #tpu.memory_space<vmem>>, vector<1x18x768xbf16>
    %1 = vector.shape_cast %0 : vector<1x18x768xbf16> to vector<18x768xbf16>
    %c0_2 = arith.constant 0 : index
    %c0_3 = arith.constant 0 : index
    %2 = vector.load %arg2[%c0_2, %c0_3] : memref<768x256xbf16, #tpu.memory_space<vmem>>, vector<768x256xbf16>
    %cst = arith.constant dense<0.000000e+00> : vector<18x256xf32>
    %3 = tpu.matmul %1, %2, %cst {dimension_numbers = #tpu.dot_dimension_numbers<[1], [0], [0], [1], [0, 0, 1, 1], [], []>} : vector<18x768xbf16>, vector<768x256xbf16>, vector<18x256xf32> -> vector<18x256xf32>
    %c0_4 = arith.constant 0 : index
    %c0_5 = arith.constant 0 : index
    %4 = vector.load %arg3[%c0_4, %c0_5] : memref<1x256xf32, #tpu.memory_space<vmem>>, vector<1x256xf32>
    %5 = vector.broadcast %4 : vector<1x256xf32> to vector<18x256xf32>
    %6 = arith.addf %3, %5 : vector<18x256xf32>
    %cst_6 = arith.constant 0.000000e+00 : f32
    %7 = vector.broadcast %cst_6 : f32 to vector<18x256xf32>
    %8 = arith.maximumf %6, %7 : vector<18x256xf32>
    %9 = arith.truncf %8 : vector<18x256xf32> to vector<18x256xbf16>
    %10 = vector.extract_strided_slice %9 {offsets = [0, 0], sizes = [6, 256], strides = [1, 1]} : vector<18x256xbf16> to vector<6x256xbf16>
    %c0_7 = arith.constant 0 : index
    %c0_8 = arith.constant 0 : index
    %c0_9 = arith.constant 0 : index
    %11 = vector.load %arg4[%c0_7, %c0_8, %c0_9] : memref<3x256x128xbf16, #tpu.memory_space<vmem>>, vector<1x256x128xbf16>
    %12 = vector.shape_cast %11 : vector<1x256x128xbf16> to vector<256x128xbf16>
    %cst_10 = arith.constant dense<0.000000e+00> : vector<6x128xf32>
    %13 = tpu.matmul %10, %12, %cst_10 {dimension_numbers = #tpu.dot_dimension_numbers<[1], [0], [0], [1], [0, 0, 1, 1], [], []>} : vector<6x256xbf16>, vector<256x128xbf16>, vector<6x128xf32> -> vector<6x128xf32>
    %14 = vector.extract_strided_slice %9 {offsets = [6, 0], sizes = [6, 256], strides = [1, 1]} : vector<18x256xbf16> to vector<6x256xbf16>
    %c1 = arith.constant 1 : index
    %c0_11 = arith.constant 0 : index
    %c0_12 = arith.constant 0 : index
    %15 = vector.load %arg4[%c1, %c0_11, %c0_12] : memref<3x256x128xbf16, #tpu.memory_space<vmem>>, vector<1x256x128xbf16>
    %16 = vector.shape_cast %15 : vector<1x256x128xbf16> to vector<256x128xbf16>
    %cst_13 = arith.constant dense<0.000000e+00> : vector<6x128xf32>
    %17 = tpu.matmul %14, %16, %cst_13 {dimension_numbers = #tpu.dot_dimension_numbers<[1], [0], [0], [1], [0, 0, 1, 1], [], []>} : vector<6x256xbf16>, vector<256x128xbf16>, vector<6x128xf32> -> vector<6x128xf32>
    %18 = arith.addf %13, %17 : vector<6x128xf32>
    %19 = vector.extract_strided_slice %9 {offsets = [12, 0], sizes = [6, 256], strides = [1, 1]} : vector<18x256xbf16> to vector<6x256xbf16>
    %c2 = arith.constant 2 : index
    %c0_14 = arith.constant 0 : index
    %c0_15 = arith.constant 0 : index
    %20 = vector.load %arg4[%c2, %c0_14, %c0_15] : memref<3x256x128xbf16, #tpu.memory_space<vmem>>, vector<1x256x128xbf16>
    %21 = vector.shape_cast %20 : vector<1x256x128xbf16> to vector<256x128xbf16>
    %cst_16 = arith.constant dense<0.000000e+00> : vector<6x128xf32>
    %22 = tpu.matmul %19, %21, %cst_16 {dimension_numbers = #tpu.dot_dimension_numbers<[1], [0], [0], [1], [0, 0, 1, 1], [], []>} : vector<6x256xbf16>, vector<256x128xbf16>, vector<6x128xf32> -> vector<6x128xf32>
    %23 = arith.addf %18, %22 : vector<6x128xf32>
    %c0_17 = arith.constant 0 : index
    %c0_18 = arith.constant 0 : index
    %24 = vector.load %arg5[%c0_17, %c0_18] : memref<1x128xf32, #tpu.memory_space<vmem>>, vector<1x128xf32>
    %25 = vector.broadcast %24 : vector<1x128xf32> to vector<6x128xf32>
    %26 = arith.addf %23, %25 : vector<6x128xf32>
    %cst_19 = arith.constant 0.000000e+00 : f32
    %27 = vector.broadcast %cst_19 : f32 to vector<6x128xf32>
    %28 = arith.maximumf %26, %27 : vector<6x128xf32>
    %29 = arith.truncf %28 : vector<6x128xf32> to vector<6x128xbf16>
    %30 = vector.extract_strided_slice %29 {offsets = [0, 0], sizes = [2, 128], strides = [1, 1]} : vector<6x128xbf16> to vector<2x128xbf16>
    %c0_20 = arith.constant 0 : index
    %c0_21 = arith.constant 0 : index
    %c0_22 = arith.constant 0 : index
    %31 = vector.load %arg6[%c0_20, %c0_21, %c0_22] : memref<3x128x128xbf16, #tpu.memory_space<vmem>>, vector<1x128x128xbf16>
    %32 = vector.shape_cast %31 : vector<1x128x128xbf16> to vector<128x128xbf16>
    %cst_23 = arith.constant dense<0.000000e+00> : vector<2x128xf32>
    %33 = tpu.matmul %30, %32, %cst_23 {dimension_numbers = #tpu.dot_dimension_numbers<[1], [0], [0], [1], [0, 0, 1, 1], [], []>} : vector<2x128xbf16>, vector<128x128xbf16>, vector<2x128xf32> -> vector<2x128xf32>
    %34 = vector.extract_strided_slice %29 {offsets = [2, 0], sizes = [2, 128], strides = [1, 1]} : vector<6x128xbf16> to vector<2x128xbf16>
    %c1_24 = arith.constant 1 : index
    %c0_25 = arith.constant 0 : index
    %c0_26 = arith.constant 0 : index
    %35 = vector.load %arg6[%c1_24, %c0_25, %c0_26] : memref<3x128x128xbf16, #tpu.memory_space<vmem>>, vector<1x128x128xbf16>
    %36 = vector.shape_cast %35 : vector<1x128x128xbf16> to vector<128x128xbf16>
    %cst_27 = arith.constant dense<0.000000e+00> : vector<2x128xf32>
    %37 = tpu.matmul %34, %36, %cst_27 {dimension_numbers = #tpu.dot_dimension_numbers<[1], [0], [0], [1], [0, 0, 1, 1], [], []>} : vector<2x128xbf16>, vector<128x128xbf16>, vector<2x128xf32> -> vector<2x128xf32>
    %38 = arith.addf %33, %37 : vector<2x128xf32>
    %39 = vector.extract_strided_slice %29 {offsets = [4, 0], sizes = [2, 128], strides = [1, 1]} : vector<6x128xbf16> to vector<2x128xbf16>
    %c2_28 = arith.constant 2 : index
    %c0_29 = arith.constant 0 : index
    %c0_30 = arith.constant 0 : index
    %40 = vector.load %arg6[%c2_28, %c0_29, %c0_30] : memref<3x128x128xbf16, #tpu.memory_space<vmem>>, vector<1x128x128xbf16>
    %41 = vector.shape_cast %40 : vector<1x128x128xbf16> to vector<128x128xbf16>
    %cst_31 = arith.constant dense<0.000000e+00> : vector<2x128xf32>
    %42 = tpu.matmul %39, %41, %cst_31 {dimension_numbers = #tpu.dot_dimension_numbers<[1], [0], [0], [1], [0, 0, 1, 1], [], []>} : vector<2x128xbf16>, vector<128x128xbf16>, vector<2x128xf32> -> vector<2x128xf32>
    %43 = arith.addf %38, %42 : vector<2x128xf32>
    %c0_32 = arith.constant 0 : index
    %c0_33 = arith.constant 0 : index
    %44 = vector.load %arg7[%c0_32, %c0_33] : memref<1x128xf32, #tpu.memory_space<vmem>>, vector<1x128xf32>
    %45 = vector.broadcast %44 : vector<1x128xf32> to vector<2x128xf32>
    %46 = arith.addf %43, %45 : vector<2x128xf32>
    %cst_34 = arith.constant 0.000000e+00 : f32
    %47 = vector.broadcast %cst_34 : f32 to vector<2x128xf32>
    %48 = arith.maximumf %46, %47 : vector<2x128xf32>
    %49 = arith.truncf %48 : vector<2x128xf32> to vector<2x128xbf16>
    %50 = vector.extract_strided_slice %49 {offsets = [0, 0], sizes = [1, 128], strides = [1, 1]} : vector<2x128xbf16> to vector<1x128xbf16>
    %c0_35 = arith.constant 0 : index
    %c0_36 = arith.constant 0 : index
    %c0_37 = arith.constant 0 : index
    %51 = vector.load %arg8[%c0_35, %c0_36, %c0_37] : memref<2x128x128xbf16, #tpu.memory_space<vmem>>, vector<1x128x128xbf16>
    %52 = vector.shape_cast %51 : vector<1x128x128xbf16> to vector<128x128xbf16>
    %cst_38 = arith.constant dense<0.000000e+00> : vector<1x128xf32>
    %53 = tpu.matmul %50, %52, %cst_38 {dimension_numbers = #tpu.dot_dimension_numbers<[1], [0], [0], [1], [0, 0, 1, 1], [], []>} : vector<1x128xbf16>, vector<128x128xbf16>, vector<1x128xf32> -> vector<1x128xf32>
    %54 = vector.extract_strided_slice %49 {offsets = [1, 0], sizes = [1, 128], strides = [1, 1]} : vector<2x128xbf16> to vector<1x128xbf16>
    %c1_39 = arith.constant 1 : index
    %c0_40 = arith.constant 0 : index
    %c0_41 = arith.constant 0 : index
    %55 = vector.load %arg8[%c1_39, %c0_40, %c0_41] : memref<2x128x128xbf16, #tpu.memory_space<vmem>>, vector<1x128x128xbf16>
    %56 = vector.shape_cast %55 : vector<1x128x128xbf16> to vector<128x128xbf16>
    %cst_42 = arith.constant dense<0.000000e+00> : vector<1x128xf32>
    %57 = tpu.matmul %54, %56, %cst_42 {dimension_numbers = #tpu.dot_dimension_numbers<[1], [0], [0], [1], [0, 0, 1, 1], [], []>} : vector<1x128xbf16>, vector<128x128xbf16>, vector<1x128xf32> -> vector<1x128xf32>
    %58 = arith.addf %53, %57 : vector<1x128xf32>
    %c0_43 = arith.constant 0 : index
    %c0_44 = arith.constant 0 : index
    %59 = vector.load %arg9[%c0_43, %c0_44] : memref<1x128xf32, #tpu.memory_space<vmem>>, vector<1x128xf32>
    %60 = arith.addf %58, %59 : vector<1x128xf32>
    %c0_45 = arith.constant 0 : index
    %c0_46 = arith.constant 0 : index
    %c0_47 = arith.constant 0 : index
    %61 = vector.load %arg10[%c0_45, %c0_46, %c0_47] : memref<1x1x128xf32, #tpu.memory_space<vmem>>, vector<1x1x128xf32>
    %62 = vector.shape_cast %61 : vector<1x1x128xf32> to vector<1x128xf32>
    %63 = vector.shape_cast %60 : vector<1x128xf32> to vector<1x1x128xf32>
    tpu.vector_store %arg10[%c0_45, %c0_46, %c0_47], %63 {strides = array<i32>} : memref<1x1x128xf32, #tpu.memory_space<vmem>>, vector<1x1x128xf32>,
    return
  }
  func.func @transform_0(%arg0: i32) -> (i32, i32, i32) {
    %c0_i32 = arith.constant 0 : i32
    %c0_i32_0 = arith.constant 0 : i32
    %c0_i32_1 = arith.constant 0 : i32
    return %arg0, %c0_i32, %c0_i32_0 : i32, i32, i32
  }
  func.func @transform_1(%arg0: i32) -> (i32, i32) {
    %c0_i32 = arith.constant 0 : i32
    %c0_i32_0 = arith.constant 0 : i32
    %c0_i32_1 = arith.constant 0 : i32
    return %c0_i32, %c0_i32_0 : i32, i32
  }
  func.func @transform_2(%arg0: i32) -> (i32, i32) {
    %c0_i32 = arith.constant 0 : i32
    %c0_i32_0 = arith.constant 0 : i32
    %c0_i32_1 = arith.constant 0 : i32
    return %c0_i32, %c0_i32_0 : i32, i32
  }
  func.func @transform_3(%arg0: i32) -> (i32, i32, i32) {
    %c0_i32 = arith.constant 0 : i32
    %c0_i32_0 = arith.constant 0 : i32
    %c0_i32_1 = arith.constant 0 : i32
    %c0_i32_2 = arith.constant 0 : i32
    return %c0_i32, %c0_i32_0, %c0_i32_1 : i32, i32, i32
  }
  func.func @transform_4(%arg0: i32) -> (i32, i32) {
    %c0_i32 = arith.constant 0 : i32
    %c0_i32_0 = arith.constant 0 : i32
    %c0_i32_1 = arith.constant 0 : i32
    return %c0_i32, %c0_i32_0 : i32, i32
  }
  func.func @transform_5(%arg0: i32) -> (i32, i32, i32) {
    %c0_i32 = arith.constant 0 : i32
    %c0_i32_0 = arith.constant 0 : i32
    %c0_i32_1 = arith.constant 0 : i32
    %c0_i32_2 = arith.constant 0 : i32
    return %c0_i32, %c0_i32_0, %c0_i32_1 : i32, i32, i32
  }
  func.func @transform_6(%arg0: i32) -> (i32, i32) {
    %c0_i32 = arith.constant 0 : i32
    %c0_i32_0 = arith.constant 0 : i32
    %c0_i32_1 = arith.constant 0 : i32
    return %c0_i32, %c0_i32_0 : i32, i32
  }
  func.func @transform_7(%arg0: i32) -> (i32, i32, i32) {
    %c0_i32 = arith.constant 0 : i32
    %c0_i32_0 = arith.constant 0 : i32
    %c0_i32_1 = arith.constant 0 : i32
    %c0_i32_2 = arith.constant 0 : i32
    return %c0_i32, %c0_i32_0, %c0_i32_1 : i32, i32, i32
  }
  func.func @transform_8(%arg0: i32) -> (i32, i32) {
    %c0_i32 = arith.constant 0 : i32
    %c0_i32_0 = arith.constant 0 : i32
    %c0_i32_1 = arith.constant 0 : i32
    return %c0_i32, %c0_i32_0 : i32, i32
  }
  func.func @transform_9(%arg0: i32) -> (i32, i32, i32) {
    %c0_i32 = arith.constant 0 : i32
    %c0_i32_0 = arith.constant 0 : i32
    %c0_i32_1 = arith.constant 0 : i32
    return %arg0, %c0_i32, %c0_i32_0 : i32, i32, i32
  }
}

</mosaic_0001>

<bundles_post_ra>
// kernel: dqn_forward.1
= control target key start
LH: loop header
LB: loop body
LE: loop exit
PB: predicated region body
PF: predicated region fallthrough
CT: control target
= control target key end

     0   :  { %s4437_s0 = inlined_call_operand.vmem [shape: bf16[2,18,768], index: 0, kind: input, shape index: {}]   ;;  %s4438_s1 = inlined_call_operand.vmem [shape: bf16[768,256], index: 1, kind: input, shape index: {}]   ;;  %s4439_s2 = inlined_call_operand.vmem [shape: f32[1,256], index: 2, kind: input, shape index: {}]   ;;  %s4440_s3 = inlined_call_operand.vmem [shape: bf16[3,256,128], index: 3, kind: input, shape index: {}]   ;;  %s4441_s4 = inlined_call_operand.vmem [shape: f32[1,128], index: 4, kind: input, shape index: {}]   ;;  %s4442_s5 = inlined_call_operand.vmem [shape: bf16[3,128,128], index: 5, kind: input, shape index: {}]   ;;  %s4443_s6 = inlined_call_operand.vmem [shape: f32[1,128], index: 6, kind: input, shape index: {}]   ;;  %s4444_s7 = inlined_call_operand.vmem [shape: bf16[2,128,128], index: 7, kind: input, shape index: {}]   ;;  %s4445_s8 = inlined_call_operand.vmem [shape: f32[1,128], index: 8, kind: input, shape index: {}]   ;;  %s4446_s9 = inlined_call_operand.hbm [shape: f32[2,1,128], index: 9, kind: output, shape index: {}]  }
   0x1   :  { %4447 = sst [smem:[#allocation5_spill]] %s4437_s0 }
   0x2   :  { %14 = vsyncpa [#allocation3], 0 }
   0x3   :  { %16 = vsyncpa [#allocation3 + $0x1], 0  ;;  %s3400_s30 = smov 0   ;;  %s3402_s10 = smov 0  }
   0x4   :  { %s3404_s11 = smov 0   ;;  %s3406_s12 = smov 0  }
   0x5 LB: > { %s3421_s13 = sadd.s32 4294967295, %s3348_s12   ;;  %s2175_s14 = sadd.s32 4294967294, %s3348_s12   ;;  %s3348_s12 = sphi %s3406_s12, %s4454_s12   ;;  %s3344_s11 = sphi %s3404_s11, %s4453_s11   ;;  %s3340_s10 = sphi %s3402_s10, %s4452_s10   ;;  %s3336_s30 = sphi %s3400_s30, %s4451_s30  }
   0x6   : > { %s3425_s15 = sadd.s32 1, %s3348_s12   ;;  %s223_s16 = sadd.s32 1, %s3344_s11 }
   0x7   : > { %s220_s17 = ssub.s32 %s3348_s12, %s3425_s15  ;;  %p233_p0 = scmp.ne.s32.totalorder %s3344_s11, %s3340_s10 }
   0x8   : > { %p221_p1 = scmp.eq.s32.totalorder %s220_s17, 0  ;;  %p234_p2 = scmp.eq.s32.totalorder %s3421_s13, 1 }
   0x9   : > { %p239_p3 = scmp.ne.s32.totalorder %s3340_s10, %s3336_s30  ;;  %p240_p4 = scmp.eq.s32.totalorder %s2175_s14, 1 }
   0xa   : > { %s3436_s18 = scalar_select %p221_p1, %s3344_s11, %s223_s16  }
   0xb   : > { %p3438_p5 = por %p234_p2, %p233_p0  ;;  %p3442_p6 = por %p240_p4, %p239_p3 }
   0xc   : > { %p2178_p7 = scmp.ge.s32.totalorder %s3348_s12, 1  ;;  %p290_p8 = scmp.lt.s32.totalorder %s3348_s12, 3 }
   0xe   : > { %p291_p9 = pnand %p2178_p7, %p290_p8 }
   0xf   : > { %p325_p10 = scmp.lt.s32.totalorder (!%p291_p9), %s3421_s13, 1  ;;  %s4450_s0 = sld [smem:[#allocation5_spill]] (!%p291_p9) }
  0x10   : > { %294 = sbr.rel (%p291_p9) target bundleno = 715 (0x2cb), region = 56  ;;  %s323_s17 = sand.u32 (!%p291_p9), 1, %s3340_s10  }
  0x11   : > { %s324_s25 = scalar_lea.vmem (!%p291_p9), [#allocation2], %s323_s17  ;;  %s2108_s14 = scalar_lea.sflag (!%p291_p9), [#allocation3], %s323_s17 }
  0x12   : > { %s3306_s21 = scalar_lea.hbm (!%p291_p9), %s4446_s9, 2 }
  0x15   : > { %v2262_v0 = vld [vmem:[%s4438_s1 + $0x70] sm:$0xf]  ;;  %v3075_v1 = vld [vmem:[%s4438_s1 + $0x74] sm:$0xf0]  ;;  %v2254_v11 = vld [vmem:[%s4438_s1 + $0x60] sm:$0xf] }
  0x16   : > { %v2326_v2 = vld [vmem:[%s4438_s1 + $0xf0] sm:$0xf]  ;;  %v2263_v3 = vor.u32 %v3075_v1, %v2262_v0  ;;  %v3091_v4 = vld [vmem:[%s4438_s1 + $0xf4] sm:$0xf0]  ;;  %v3073_v13 = vld [vmem:[%s4438_s1 + $0x64] sm:$0xf0] }
  0x17   : > { %v2390_v5 = vld [vmem:[%s4438_s1 + $0x170] sm:$0xf]  ;;  %v3107_v6 = vld [vmem:[%s4438_s1 + $0x174] sm:$0xf0]  ;;  %v2327_v7 = vor.u32 %v3091_v4, %v2326_v2  ;;  %v2318_v14 = vld [vmem:[%s4438_s1 + $0xe0] sm:$0xf]  ;;  %v2255_v16 = vor.u32 %v3073_v13, %v2254_v11 }
  0x18   : > { %v2391_v8 = vor.u32 %v3107_v6, %v2390_v5  ;;  %v2454_v9 = vld [vmem:[%s4438_s1 + $0x1f0] sm:$0xf]  ;;  %v3123_v10 = vld [vmem:[%s4438_s1 + $0x1f4] sm:$0xf0]  ;;  %972 = vmatpush.bf16.msra.mxu0 %v2263_v3  ;;  %v3089_v15 = vld [vmem:[%s4438_s1 + $0xe4] sm:$0xf0] }
  0x19   : > { %v2455_v12 = vor.u32 %v3123_v10, %v2454_v9  ;;  %990 = vmatpush.bf16.msra.mxu1 %v2327_v7  ;;  %v2319_v17 = vor.u32 %v3089_v15, %v2318_v14  ;;  %v2382_v18 = vld [vmem:[%s4438_s1 + $0x160] sm:$0xf]  ;;  %v3105_v19 = vld [vmem:[%s4438_s1 + $0x164] sm:$0xf0]  ;;  %v2246_v23 = vld [vmem:[%s4438_s1 + $0x50] sm:$0xf] }
  0x1a   : > { %1008 = vmatpush.bf16.msra.mxu2 %v2391_v8  ;;  %v2446_v20 = vld [vmem:[%s4438_s1 + $0x1e0] sm:$0xf]  ;;  %v2383_v21 = vor.u32 %v3105_v19, %v2382_v18  ;;  %v3121_v22 = vld [vmem:[%s4438_s1 + $0x1e4] sm:$0xf0]  ;;  %v3071_v24 = vld [vmem:[%s4438_s1 + $0x54] sm:$0xf0] }
  0x1b   : > { %1026 = vmatpush.bf16.msra.mxu3 %v2455_v12  ;;  %v2447_v25 = vor.u32 %v3121_v22, %v2446_v20  ;;  %v2310_v26 = vld [vmem:[%s4438_s1 + $0xd0] sm:$0xf]  ;;  %v3087_v27 = vld [vmem:[%s4438_s1 + $0xd4] sm:$0xf0]  ;;  %v2247_v29 = vor.u32 %v3071_v24, %v2246_v23  ;;  %v2238_v35 = vld [vmem:[%s4438_s1 + $0x40] sm:$0xf] }
  0x1c   : > { %v2374_v28 = vld [vmem:[%s4438_s1 + $0x150] sm:$0xf]  ;;  %973 = vmatpush.bf16.msra.mxu0 %v2255_v16  ;;  %v3103_v30 = vld [vmem:[%s4438_s1 + $0x154] sm:$0xf0]  ;;  %v2311_v33 = vor.u32 %v3087_v27, %v2310_v26  ;;  %v3069_v36 = vld [vmem:[%s4438_s1 + $0x44] sm:$0xf0] }
  0x1d   : > { %v2438_v31 = vld [vmem:[%s4438_s1 + $0x1d0] sm:$0xf]  ;;  %v3119_v32 = vld [vmem:[%s4438_s1 + $0x1d4] sm:$0xf0]  ;;  %991 = vmatpush.bf16.msra.mxu1 %v2319_v17  ;;  %v2375_v34 = vor.u32 %v3103_v30, %v2374_v28  ;;  %v2302_v37 = vld [vmem:[%s4438_s1 + $0xc0] sm:$0xf]  ;;  %v2239_v44 = vor.u32 %v3069_v36, %v2238_v35 }
  0x1e   : > { %1009 = vmatpush.bf16.msra.mxu2 %v2383_v21  ;;  %v2439_v38 = vor.u32 %v3119_v32, %v2438_v31  ;;  %v3085_v39 = vld [vmem:[%s4438_s1 + $0xc4] sm:$0xf0]  ;;  %v2366_v40 = vld [vmem:[%s4438_s1 + $0x140] sm:$0xf]  ;;  %v2230_v47 = vld [vmem:[%s4438_s1 + $0x30] sm:$0xf] }
  0x1f   : > { %1027 = vmatpush.bf16.msra.mxu3 %v2447_v25  ;;  %v3101_v41 = vld [vmem:[%s4438_s1 + $0x144] sm:$0xf0]  ;;  %v2430_v42 = vld [vmem:[%s4438_s1 + $0x1c0] sm:$0xf]  ;;  %v2303_v45 = vor.u32 %v3085_v39, %v2302_v37  ;;  %v3067_v48 = vld [vmem:[%s4438_s1 + $0x34] sm:$0xf0] }
  0x20   : > { %v3117_v43 = vld [vmem:[%s4438_s1 + $0x1c4] sm:$0xf0]  ;;  %974 = vmatpush.bf16.msra.mxu0 %v2247_v29  ;;  %v2367_v46 = vor.u32 %v3101_v41, %v2366_v40  ;;  %v2294_v49 = vld [vmem:[%s4438_s1 + $0xb0] sm:$0xf]  ;;  %v3083_v51 = vld [vmem:[%s4438_s1 + $0xb4] sm:$0xf0]  ;;  %v2231_v56 = vor.u32 %v3067_v48, %v2230_v47 }
  0x21   : > { %992 = vmatpush.bf16.msra.mxu1 %v2311_v33  ;;  %v2431_v50 = vor.u32 %v3117_v43, %v2430_v42  ;;  %v2358_v52 = vld [vmem:[%s4438_s1 + $0x130] sm:$0xf]  ;;  %v3099_v53 = vld [vmem:[%s4438_s1 + $0x134] sm:$0xf0]  ;;  %v2295_v57 = vor.u32 %v3083_v51, %v2294_v49  ;;  %v2222_v59 = vld [vmem:[%s4438_s1 + $0x20] sm:$0xf] }
  0x22   : > { %1010 = vmatpush.bf16.msra.mxu2 %v2375_v34  ;;  %v2422_v54 = vld [vmem:[%s4438_s1 + $0x1b0] sm:$0xf]  ;;  %v3115_v55 = vld [vmem:[%s4438_s1 + $0x1b4] sm:$0xf0]  ;;  %v2359_v58 = vor.u32 %v3099_v53, %v2358_v52  ;;  %v3065_v60 = vld [vmem:[%s4438_s1 + $0x24] sm:$0xf0] }
  0x23   : > { %1028 = vmatpush.bf16.msra.mxu3 %v2439_v38  ;;  %v2286_v61 = vld [vmem:[%s4438_s1 + $0xa0] sm:$0xf]  ;;  %v2423_v62 = vor.u32 %v3115_v55, %v2422_v54  ;;  %v3081_v63 = vld [vmem:[%s4438_s1 + $0xa4] sm:$0xf0]  ;;  %v2223_v4 = vor.u32 %v3065_v60, %v2222_v59  ;;  %v2214_v5 = vld [vmem:[%s4438_s1 + $0x10] sm:$0xf] }
  0x24   : > { %975 = vmatpush.bf16.msra.mxu0 %v2239_v44  ;;  %v2350_v0 = vld [vmem:[%s4438_s1 + $0x120] sm:$0xf]  ;;  %v3097_v1 = vld [vmem:[%s4438_s1 + $0x124] sm:$0xf0]  ;;  %v2287_v6 = vor.u32 %v3081_v63, %v2286_v61  ;;  %v3063_v8 = vld [vmem:[%s4438_s1 + $0x14] sm:$0xf0] }
  0x25   : > { %993 = vmatpush.bf16.msra.mxu1 %v2303_v45  ;;  %v2414_v2 = vld [vmem:[%s4438_s1 + $0x1a0] sm:$0xf]  ;;  %v3113_v3 = vld [vmem:[%s4438_s1 + $0x1a4] sm:$0xf0]  ;;  %v2351_v7 = vor.u32 %v3097_v1, %v2350_v0  ;;  %v2278_v9 = vld [vmem:[%s4438_s1 + $0x90] sm:$0xf]  ;;  %v2215_v16 = vor.u32 %v3063_v8, %v2214_v5 }
  0x26   : > { %1011 = vmatpush.bf16.msra.mxu2 %v2367_v46  ;;  %v3079_v10 = vld [vmem:[%s4438_s1 + $0x94] sm:$0xf0]  ;;  %v2415_v11 = vor.u32 %v3113_v3, %v2414_v2  ;;  %v2342_v12 = vld [vmem:[%s4438_s1 + $0x110] sm:$0xf]  ;;  %v2206_v17 = vld [vmem:[%s4438_s1] sm:$0xf] }
  0x27   : > { %1029 = vmatpush.bf16.msra.mxu3 %v2431_v50  ;;  %v3095_v13 = vld [vmem:[%s4438_s1 + $0x114] sm:$0xf0]  ;;  %v2406_v14 = vld [vmem:[%s4438_s1 + $0x190] sm:$0xf]  ;;  %v3061_v18 = vld [vmem:[%s4438_s1 + $0x4] sm:$0xf0]  ;;  %v2279_v19 = vor.u32 %v3079_v10, %v2278_v9 }
  0x28   : > { %976 = vmatpush.bf16.msra.mxu0 %v2231_v56  ;;  %v3111_v15 = vld [vmem:[%s4438_s1 + $0x194] sm:$0xf0]  ;;  %s326_s29 = scalar_select %p325_p10, %s3421_s13, 1  ;;  %v2343_v20 = vor.u32 %v3095_v13, %v2342_v12  ;;  %v2270_v21 = vld [vmem:[%s4438_s1 + $0x80] sm:$0xf]  ;;  %v2207_v30 = vor.u32 %v3061_v18, %v2206_v17 }
  0x29   : > { %994 = vmatpush.bf16.msra.mxu1 %v2295_v57  ;;  %v3077_v22 = vld [vmem:[%s4438_s1 + $0x84] sm:$0xf0]  ;;  %v2334_v23 = vld [vmem:[%s4438_s1 + $0x100] sm:$0xf]  ;;  %v2407_v24 = vor.u32 %v3111_v15, %v2406_v14  ;;  %v3074_v28 = vld [vmem:[%s4438_s1 + $0x74] sm:$0xf] }
  0x2a   : > { %1012 = vmatpush.bf16.msra.mxu2 %v2359_v58  ;;  %v3093_v25 = vld [vmem:[%s4438_s1 + $0x104] sm:$0xf0]  ;;  %v2398_v26 = vld [vmem:[%s4438_s1 + $0x180] sm:$0xf]  ;;  %s3244_s28 = smul.u32 72, %s326_s29  ;;  %v2271_v35 = vor.u32 %v3077_v22, %v2270_v21  ;;  %s2118_s29 = sshll.u32 %s324_s25, 4  ;;  %s2119_s29 = int_to_ptr.vmem [resolvable:$true] %s2118_s29 }
  0x2b   : > { %1030 = vmatpush.bf16.msra.mxu3 %v2423_v62  ;;  %v3109_v27 = vld [vmem:[%s4438_s1 + $0x184] sm:$0xf0]  ;;  %v2264_v29 = vld [vmem:[%s4438_s1 + $0x78] sm:$0xf0]  ;;  %v2518_v31 = vld [vmem:[%s4438_s1 + $0x270] sm:$0xf]  ;;  %v2335_v36 = vor.u32 %v3093_v25, %v2334_v23 }
  0x2c   : > { %977 = vmatpush.bf16.msra.mxu0 %v2223_v4  ;;  %s3651_s26 = scalar_lea.vmem %s4450_s0, %s3244_s28  ;;  %v3139_v32 = vld [vmem:[%s4438_s1 + $0x274] sm:$0xf0]  ;;  %v2582_v33 = vld [vmem:[%s4438_s1 + $0x2f0] sm:$0xf]  ;;  %v3090_v40 = vld [vmem:[%s4438_s1 + $0xf4] sm:$0xf]  ;;  %v2399_v43 = vor.u32 %v3109_v27, %v2398_v26  ;;  %v2267_v47 = vor.u32 %v3074_v28, %v2264_v29  ;;  %s2116_s28 = scalar_lea.hbm %s4446_s9, %s3421_s13 }
  0x2d   : > { %995 = vmatpush.bf16.msra.mxu1 %v2287_v6  ;;  %v3155_v34 = vld [vmem:[%s4438_s1 + $0x2f4] sm:$0xf0]  ;;  %v2182_v37 = vld [vmem:[%s3651_s26] sm:$0xf]  ;;  %v3054_v39 = vld [vmem:[%s3651_s26 + $0x4] sm:$0xf]  ;;  %v2519_v58 = vor.u32 %v3139_v32, %v2518_v31 }
  0x2e   : > { %1013 = vmatpush.bf16.msra.mxu2 %v2351_v7  ;;  %v3057_v38 = vld [vmem:[%s3651_s26 + $0x14] sm:$0xf0]  ;;  %v2328_v41 = vld [vmem:[%s4438_s1 + $0xf8] sm:$0xf0]  ;;  %v3072_v42 = vld [vmem:[%s4438_s1 + $0x64] sm:$0xf]  ;;  %v2583_v51 = vor.u32 %v3155_v34, %v2582_v33 }
  0x2f   : > { %1031 = vmatpush.bf16.msra.mxu3 %v2415_v11  ;;  %v2184_v44 = vld [vmem:[%s3651_s26 + $0x18] sm:$0xf0]  ;;  %v2190_v45 = vld [vmem:[%s3651_s26 + $0x8] sm:$0xf]  ;;  %v3058_v46 = vld [vmem:[%s3651_s26 + $0x1c] sm:$0xf0]  ;;  %v3680_v48 = vor.u32 %v3057_v38, %v2182_v37  ;;  %v2331_v59 = vor.u32 %v3090_v40, %v2328_v41 }
  0x30   : > { %978 = vmatpush.bf16.msra.mxu0 %v2215_v16  ;;  %v3055_v49 = vld [vmem:[%s3651_s26 + $0xc] sm:$0xf]  ;;  %v2192_v50 = vld [vmem:[%s3651_s26 + $0x20] sm:$0xf0]  ;;  %v3687_v53 = vor.u32 %v3054_v39, %v2184_v44  ;;  %v3689_v54 = vor.u32 %v3058_v46, %v2190_v45  ;;  %v2574_v55 = vld [vmem:[%s4438_s1 + $0x2e0] sm:$0xf] }
  0x31   : > { %996 = vmatpush.bf16.msra.mxu1 %v2279_v19  ;;  %v2256_v52 = vld [vmem:[%s4438_s1 + $0x68] sm:$0xf0]  ;;  %v3153_v56 = vld [vmem:[%s4438_s1 + $0x2e4] sm:$0xf0]  ;;  %v3697_v57 = vor.u32 %v3055_v49, %v2192_v50  ;;  %v2510_v61 = vld [vmem:[%s4438_s1 + $0x260] sm:$0xf] }
  0x32   : > { %1014 = vmatpush.bf16.msra.mxu2 %v2343_v20  ;;  %v2259_v60 = vor.u32 %v3072_v42, %v2256_v52  ;;  %v3137_v62 = vld [vmem:[%s4438_s1 + $0x264] sm:$0xf0]  ;;  %v3088_v63 = vld [vmem:[%s4438_s1 + $0xe4] sm:$0xf]  ;;  %v2575_v0 = vor.u32 %v3153_v56, %v2574_v55  ;;  %v2320_v1 = vld [vmem:[%s4438_s1 + $0xe8] sm:$0xf0] }
  0x33   : > { %1032 = vmatpush.bf16.msra.mxu3 %v2407_v24  ;;  %v3070_v2 = vld [vmem:[%s4438_s1 + $0x54] sm:$0xf]  ;;  %v2248_v3 = vld [vmem:[%s4438_s1 + $0x58] sm:$0xf0]  ;;  %v2566_v4 = vld [vmem:[%s4438_s1 + $0x2d0] sm:$0xf]  ;;  %v2511_v6 = vor.u32 %v3137_v62, %v2510_v61  ;;  %v2323_v7 = vor.u32 %v3088_v63, %v2320_v1 }
  0x34   : > { %979 = vmatpush.bf16.msra.mxu0 %v2207_v30  ;;  %v3151_v5 = vld [vmem:[%s4438_s1 + $0x2d4] sm:$0xf0]  ;;  %v2251_v8 = vor.u32 %v3070_v2, %v2248_v3  ;;  %v2502_v9 = vld [vmem:[%s4438_s1 + $0x250] sm:$0xf]  ;;  %v3086_v11 = vld [vmem:[%s4438_s1 + $0xd4] sm:$0xf] }
  0x35   : > { %997 = vmatpush.bf16.msra.mxu1 %v2271_v35  ;;  %v3135_v10 = vld [vmem:[%s4438_s1 + $0x254] sm:$0xf0]  ;;  %v2567_v12 = vor.u32 %v3151_v5, %v2566_v4  ;;  %v2312_v13 = vld [vmem:[%s4438_s1 + $0xd8] sm:$0xf0]  ;;  %v3068_v14 = vld [vmem:[%s4438_s1 + $0x44] sm:$0xf] }
  0x36   : > { %1015 = vmatpush.bf16.msra.mxu2 %v2335_v36  ;;  %v2240_v15 = vld [vmem:[%s4438_s1 + $0x48] sm:$0xf0]  ;;  %v2558_v16 = vld [vmem:[%s4438_s1 + $0x2c0] sm:$0xf]  ;;  %v3149_v17 = vld [vmem:[%s4438_s1 + $0x2c4] sm:$0xf0]  ;;  %v2503_v19 = vor.u32 %v3135_v10, %v2502_v9  ;;  %v2315_v21 = vor.u32 %v3086_v11, %v2312_v13 }
  0x37   : > { %1033 = vmatpush.bf16.msra.mxu3 %v2399_v43  ;;  %980 = vmatmul.bf16.vlgmr.msra.gmra.mxu0 %v3680_v48  ;;  %v336_v18 = vld [vmem:[%s3651_s26 + $0x30] sm:$0x11]  ;;  %v337_v20 = vld [vmem:[%s3651_s26 + $0x38] sm:$0x11]  ;;  %v2243_v22 = vor.u32 %v3068_v14, %v2240_v15  ;;  %v2494_v23 = vld [vmem:[%s4438_s1 + $0x240] sm:$0xf]  ;;  %v2559_v26 = vor.u32 %v3149_v17, %v2558_v16 }
  0x38   : > { %998 = vmatmul.bf16.vlgmr.msra.gmra.mxu1 %v3687_v53  ;;  %1044 = vmatpush.bf16.msrb.mxu0 %v2519_v58  ;;  %v3133_v24 = vld [vmem:[%s4438_s1 + $0x244] sm:$0xf0]  ;;  %v3084_v25 = vld [vmem:[%s4438_s1 + $0xc4] sm:$0xf]  ;;  %v2304_v27 = vld [vmem:[%s4438_s1 + $0xc8] sm:$0xf0]  ;;  %v462_v28 = vunpack.c.l.b16 %v336_v18  ;;  %v463_v31 = vunpack.c.h.b16 %v336_v18  ;;  %v464_v32 = vunpack.c.l.b16 %v337_v20  ;;  %v465_v36 = vunpack.c.h.b16 %v337_v20 }
  0x39   : > { %1062 = vmatpush.bf16.msrb.mxu1 %v2583_v51  ;;  %1016 = vmatmul.bf16.vlgmr.msra.gmra.mxu2 %v3689_v54  ;;  %v3066_v29 = vld [vmem:[%s4438_s1 + $0x34] sm:$0xf]  ;;  %v2232_v30 = vld [vmem:[%s4438_s1 + $0x38] sm:$0xf0]  ;;  %v2550_v33 = vld [vmem:[%s4438_s1 + $0x2b0] sm:$0xf]  ;;  %v2495_v35 = vor.u32 %v3133_v24, %v2494_v23  ;;  %v2307_v37 = vor.u32 %v3084_v25, %v2304_v27 }
  0x3a   : > { %1080 = vmatpush.bf16.msrb.mxu2 %v2267_v47  ;;  %1034 = vmatmul.bf16.vlgmr.msra.gmra.mxu3 %v3697_v57  ;;  %v3147_v34 = vld [vmem:[%s4438_s1 + $0x2b4] sm:$0xf0]  ;;  %v2235_v38 = vor.u32 %v3066_v29, %v2232_v30  ;;  %v2486_v39 = vld [vmem:[%s4438_s1 + $0x230] sm:$0xf]  ;;  %v3082_v41 = vld [vmem:[%s4438_s1 + $0xb4] sm:$0xf]  ;;  %v3786_v42 = vpack.c.b16 %v462_v28, %v462_v28  ;;  %v3797_v47 = vpack.c.b16 %v463_v31, %v463_v31 }
  0x3b   : > { %1098 = vmatpush.bf16.msrb.mxu3 %v2331_v59  ;;  %v3131_v40 = vld [vmem:[%s4438_s1 + $0x234] sm:$0xf0]  ;;  %v2551_v43 = vor.u32 %v3147_v34, %v2550_v33  ;;  %v2296_v44 = vld [vmem:[%s4438_s1 + $0xb8] sm:$0xf0]  ;;  %v3064_v45 = vld [vmem:[%s4438_s1 + $0x24] sm:$0xf]  ;;  %v3799_v49 = vpack.c.b16 %v464_v32, %v464_v32  ;;  %v3807_v52 = vpack.c.b16 %v465_v36, %v465_v36 }
  0x3c   : > { %1045 = vmatpush.bf16.msrb.mxu0 %v2511_v6  ;;  %v2224_v46 = vld [vmem:[%s4438_s1 + $0x28] sm:$0xf0]  ;;  %v2542_v50 = vld [vmem:[%s4438_s1 + $0x2a0] sm:$0xf]  ;;  %v3145_v51 = vld [vmem:[%s4438_s1 + $0x2a4] sm:$0xf0]  ;;  %v2487_v55 = vor.u32 %v3131_v40, %v2486_v39  ;;  %v2299_v56 = vor.u32 %v3082_v41, %v2296_v44 }
  0x3d   : > { %1063 = vmatpush.bf16.msrb.mxu1 %v2575_v0  ;;  %v2227_v58 = vor.u32 %v3064_v45, %v2224_v46  ;;  %v2478_v59 = vld [vmem:[%s4438_s1 + $0x220] sm:$0xf]  ;;  %v3080_v61 = vld [vmem:[%s4438_s1 + $0xa4] sm:$0xf]  ;;  %v2543_v62 = vor.u32 %v3145_v51, %v2542_v50  ;;  %v2288_v63 = vld [vmem:[%s4438_s1 + $0xa8] sm:$0xf0] }
  0x3e   : > { %1081 = vmatpush.bf16.msrb.mxu2 %v2259_v60  ;;  %v3129_v60 = vld [vmem:[%s4438_s1 + $0x224] sm:$0xf0]  ;;  %v3062_v0 = vld [vmem:[%s4438_s1 + $0x14] sm:$0xf]  ;;  %v2216_v1 = vld [vmem:[%s4438_s1 + $0x18] sm:$0xf0]  ;;  %v2291_v6 = vor.u32 %v3080_v61, %v2288_v63 }
  0x3f   : > { %1099 = vmatpush.bf16.msrb.mxu3 %v2323_v7  ;;  %v2534_v2 = vld [vmem:[%s4438_s1 + $0x290] sm:$0xf]  ;;  %v3143_v3 = vld [vmem:[%s4438_s1 + $0x294] sm:$0xf0]  ;;  %v2479_v4 = vor.u32 %v3129_v60, %v2478_v59  ;;  %v2219_v7 = vor.u32 %v3062_v0, %v2216_v1  ;;  %v3078_v9 = vld [vmem:[%s4438_s1 + $0x94] sm:$0xf] }
  0x40   : > { %1046 = vmatpush.bf16.msrb.mxu0 %v2503_v19  ;;  %v2470_v5 = vld [vmem:[%s4438_s1 + $0x210] sm:$0xf]  ;;  %v2280_v10 = vld [vmem:[%s4438_s1 + $0x98] sm:$0xf0]  ;;  %v2535_v11 = vor.u32 %v3143_v3, %v2534_v2  ;;  %v2208_v13 = vld [vmem:[%s4438_s1 + $0x8] sm:$0xf0] }
  0x41   : > { %1064 = vmatpush.bf16.msrb.mxu1 %v2567_v12  ;;  %v3060_v12 = vld [vmem:[%s4438_s1 + $0x4] sm:$0xf]  ;;  %v2526_v14 = vld [vmem:[%s4438_s1 + $0x280] sm:$0xf]  ;;  %v3141_v15 = vld [vmem:[%s4438_s1 + $0x284] sm:$0xf0] }
  0x42   : > { %1082 = vmatpush.bf16.msrb.mxu2 %v2251_v8  ;;  %v3127_v8 = vld [vmem:[%s4438_s1 + $0x214] sm:$0xf0]  ;;  %v3138_v16 = vld [vmem:[%s4438_s1 + $0x274] sm:$0xf]  ;;  %v2520_v17 = vld [vmem:[%s4438_s1 + $0x278] sm:$0xf0]  ;;  %v2211_v23 = vor.u32 %v3060_v12, %v2208_v13  ;;  %v2527_v27 = vor.u32 %v3141_v15, %v2526_v14 }
  0x43   : > { %1100 = vmatpush.bf16.msrb.mxu3 %v2315_v21  ;;  %v2471_v18 = vor.u32 %v3127_v8, %v2470_v5  ;;  %v2462_v19 = vld [vmem:[%s4438_s1 + $0x200] sm:$0xf]  ;;  %v3122_v20 = vld [vmem:[%s4438_s1 + $0x1f4] sm:$0xf]  ;;  %v2456_v21 = vld [vmem:[%s4438_s1 + $0x1f8] sm:$0xf0]  ;;  %v2523_v29 = vor.u32 %v3138_v16, %v2520_v17 }
  0x44   : > { %1047 = vmatpush.bf16.msrb.mxu0 %v2495_v35  ;;  %v3125_v24 = vld [vmem:[%s4438_s1 + $0x204] sm:$0xf0]  ;;  %v3076_v25 = vld [vmem:[%s4438_s1 + $0x84] sm:$0xf]  ;;  %v2198_v28 = vld [vmem:[%s3651_s26 + $0x10] sm:$0xf]  ;;  %v2459_v33 = vor.u32 %v3122_v20, %v2456_v21 }
  0x45   : > { %1065 = vmatpush.bf16.msrb.mxu1 %v2559_v26  ;;  %v2272_v26 = vld [vmem:[%s4438_s1 + $0x88] sm:$0xf0]  ;;  %v3106_v30 = vld [vmem:[%s4438_s1 + $0x174] sm:$0xf]  ;;  %v2392_v31 = vld [vmem:[%s4438_s1 + $0x178] sm:$0xf0] }
  0x46   : > { %1083 = vmatpush.bf16.msrb.mxu2 %v2243_v22  ;;  %v2283_v22 = vor.u32 %v3078_v9, %v2280_v10  ;;  %v3154_v32 = vld [vmem:[%s4438_s1 + $0x2f4] sm:$0xf]  ;;  %v2584_v34 = vld [vmem:[%s4438_s1 + $0x2f8] sm:$0xf0]  ;;  %v3136_v35 = vld [vmem:[%s4438_s1 + $0x264] sm:$0xf]  ;;  %v2275_v41 = vor.u32 %v3076_v25, %v2272_v26 }
  0x47   : > { %1101 = vmatpush.bf16.msrb.mxu3 %v2307_v37  ;;  %985 = vmatmul.bf16.gmra.mxu0 %v3786_v42  ;;  %v2512_v36 = vld [vmem:[%s4438_s1 + $0x268] sm:$0xf0]  ;;  %v2463_v37 = vor.u32 %v3125_v24, %v2462_v19  ;;  %v3056_v39 = vld [vmem:[%s3651_s26 + $0x14] sm:$0xf]  ;;  %v3104_v44 = vld [vmem:[%s4438_s1 + $0x164] sm:$0xf]  ;;  %v2587_v46 = vor.u32 %v3154_v32, %v2584_v34 }
  0x48   : > { %1003 = vmatmul.bf16.gmra.mxu1 %v3797_v47  ;;  %1048 = vmatpush.bf16.msrb.mxu0 %v2487_v55  ;;  %v2200_v40 = vld [vmem:[%s3651_s26 + $0x28] sm:$0xf0]  ;;  %v2515_v50 = vor.u32 %v3136_v35, %v2512_v36  ;;  %v3120_v51 = vld [vmem:[%s4438_s1 + $0x1e4] sm:$0xf]  ;;  %v3134_v61 = vld [vmem:[%s4438_s1 + $0x254] sm:$0xf] }
  0x49   : > { %1066 = vmatpush.bf16.msrb.mxu1 %v2551_v43  ;;  %1021 = vmatmul.bf16.gmra.mxu2 %v3799_v49  ;;  %v2395_v43 = vor.u32 %v3106_v30, %v2392_v31  ;;  %v2384_v45 = vld [vmem:[%s4438_s1 + $0x168] sm:$0xf0]  ;;  %v3924_v59 = vor.u32 %v3056_v39, %v2200_v40  ;;  %v3102_v1 = vld [vmem:[%s4438_s1 + $0x154] sm:$0xf]  ;;  %v2376_v2 = vld [vmem:[%s4438_s1 + $0x158] sm:$0xf0] }
  0x4a   : > { %1084 = vmatpush.bf16.msrb.mxu2 %v2235_v38  ;;  %1039 = vmatmul.bf16.gmra.mxu3 %v3807_v52  ;;  %v3059_v38 = vld [vmem:[%s3651_s26 + $0x24] sm:$0xf0]  ;;  %v2448_v55 = vld [vmem:[%s4438_s1 + $0x1e8] sm:$0xf0]  ;;  %v2387_v63 = vor.u32 %v3104_v44, %v2384_v45  ;;  %v3118_v5 = vld [vmem:[%s4438_s1 + $0x1d4] sm:$0xf]  ;;  %v2379_v12 = vor.u32 %v3102_v1, %v2376_v2 }
  0x4b   : > { %1102 = vmatpush.bf16.msrb.mxu3 %v2299_v56  ;;  %v3152_v56 = vld [vmem:[%s4438_s1 + $0x2e4] sm:$0xf]  ;;  %v2576_v60 = vld [vmem:[%s4438_s1 + $0x2e8] sm:$0xf0]  ;;  %v2451_v0 = vor.u32 %v3120_v51, %v2448_v55  ;;  %v2568_v8 = vld [vmem:[%s4438_s1 + $0x2d8] sm:$0xf0] }
  0x4c   : > { %1049 = vmatpush.bf16.msrb.mxu0 %v2479_v4  ;;  %v2579_v3 = vor.u32 %v3152_v56, %v2576_v60  ;;  %v3132_v9 = vld [vmem:[%s4438_s1 + $0x244] sm:$0xf]  ;;  %v2496_v10 = vld [vmem:[%s4438_s1 + $0x248] sm:$0xf0]  ;;  %v3130_v19 = vld [vmem:[%s4438_s1 + $0x234] sm:$0xf] }
  0x4d   : > { %1067 = vmatpush.bf16.msrb.mxu1 %v2543_v62  ;;  %v2504_v62 = vld [vmem:[%s4438_s1 + $0x258] sm:$0xf0]  ;;  %v2368_v14 = vld [vmem:[%s4438_s1 + $0x148] sm:$0xf0]  ;;  %v3116_v15 = vld [vmem:[%s4438_s1 + $0x1c4] sm:$0xf]  ;;  %v2499_v16 = vor.u32 %v3132_v9, %v2496_v10 }
  0x4e   : > { %1085 = vmatpush.bf16.msrb.mxu2 %v2227_v58  ;;  %v3922_v58 = vor.u32 %v3059_v38, %v2198_v28  ;;  %v2507_v4 = vor.u32 %v3134_v61, %v2504_v62  ;;  %v3148_v17 = vld [vmem:[%s4438_s1 + $0x2c4] sm:$0xf]  ;;  %v2488_v20 = vld [vmem:[%s4438_s1 + $0x238] sm:$0xf0]  ;;  %v3098_v24 = vld [vmem:[%s4438_s1 + $0x134] sm:$0xf] }
  0x4f   : > { %1103 = vmatpush.bf16.msrb.mxu3 %v2291_v6  ;;  %v2440_v6 = vld [vmem:[%s4438_s1 + $0x1d8] sm:$0xf0]  ;;  %v338_v21 = vld [vmem:[%s3651_s26 + $0x40] sm:$0x11]  ;;  %v3114_v28 = vld [vmem:[%s4438_s1 + $0x1b4] sm:$0xf] }
  0x50   : > { %1050 = vmatpush.bf16.msrb.mxu0 %v2471_v18  ;;  %v2443_v13 = vor.u32 %v3118_v5, %v2440_v6  ;;  %v2560_v18 = vld [vmem:[%s4438_s1 + $0x2c8] sm:$0xf0]  ;;  %v2360_v25 = vld [vmem:[%s4438_s1 + $0x138] sm:$0xf0]  ;;  %v3146_v30 = vld [vmem:[%s4438_s1 + $0x2b4] sm:$0xf]  ;;  %v466_v31 = vunpack.c.l.b16 %v338_v21  ;;  %v467_v32 = vunpack.c.h.b16 %v338_v21 }
  0x51   : > { %1068 = vmatpush.bf16.msrb.mxu1 %v2535_v11  ;;  %v3100_v11 = vld [vmem:[%s4438_s1 + $0x144] sm:$0xf]  ;;  %v2563_v26 = vor.u32 %v3148_v17, %v2560_v18  ;;  %v2480_v35 = vld [vmem:[%s4438_s1 + $0x228] sm:$0xf0]  ;;  %v2363_v36 = vor.u32 %v3098_v24, %v2360_v25  ;;  %v3126_v55 = vld [vmem:[%s4438_s1 + $0x214] sm:$0xf] }
  0x52   : > { %1086 = vmatpush.bf16.msrb.mxu2 %v2219_v7  ;;  %v3150_v7 = vld [vmem:[%s4438_s1 + $0x2d4] sm:$0xf]  ;;  %v3128_v34 = vld [vmem:[%s4438_s1 + $0x224] sm:$0xf]  ;;  %v2352_v39 = vld [vmem:[%s4438_s1 + $0x128] sm:$0xf0] }
  0x53   : > { %1104 = vmatpush.bf16.msrb.mxu3 %v2283_v22  ;;  %v2371_v22 = vor.u32 %v3100_v11, %v2368_v14  ;;  %v3096_v38 = vld [vmem:[%s4438_s1 + $0x124] sm:$0xf]  ;;  %v2416_v44 = vld [vmem:[%s4438_s1 + $0x1a8] sm:$0xf0]  ;;  %v2472_v56 = vld [vmem:[%s4438_s1 + $0x218] sm:$0xf0] }
  0x54   : > { %1051 = vmatpush.bf16.msrb.mxu0 %v2463_v37  ;;  %v3144_v45 = vld [vmem:[%s4438_s1 + $0x2a4] sm:$0xf]  ;;  %v2544_v51 = vld [vmem:[%s4438_s1 + $0x2a8] sm:$0xf0]  ;;  %v2355_v60 = vor.u32 %v3096_v38, %v2352_v39  ;;  %v3094_v62 = vld [vmem:[%s4438_s1 + $0x114] sm:$0xf]  ;;  %v2475_v1 = vor.u32 %v3126_v55, %v2472_v56 }
  0x55   : > { %1069 = vmatpush.bf16.msrb.mxu1 %v2527_v27  ;;  %v2491_v27 = vor.u32 %v3130_v19, %v2488_v20  ;;  %v3110_v2 = vld [vmem:[%s4438_s1 + $0x194] sm:$0xf]  ;;  %v2536_v5 = vld [vmem:[%s4438_s1 + $0x298] sm:$0xf0]  ;;  %v3124_v6 = vld [vmem:[%s4438_s1 + $0x204] sm:$0xf] }
  0x56   : > { %1087 = vmatpush.bf16.msrb.mxu2 %v2211_v23  ;;  %v3092_v10 = vld [vmem:[%s4438_s1 + $0x104] sm:$0xf]  ;;  %v4089_v17 = vld [vmem:[%s4439_s2] sm:$0x3]  ;;  %v3162_v39 = vld [vmem:[%s4440_s3 + $0x30] sm:$0xff]  ;;  %s2120_s27 = sshll.u32 %s2116_s28, 4  ;;  %s2121_s27 = int_to_ptr.hbm [resolvable:$true] %s2120_s27 }
  0x57   : > { %1105 = vmatpush.bf16.msrb.mxu3 %v2275_v41  ;;  %1052 = vmatmul.bf16.vlgmr.msrb.gmra.mxu0 %v3922_v58  ;;  %v2483_v41 = vor.u32 %v3128_v34, %v2480_v35  ;;  %v3140_v14 = vld [vmem:[%s4438_s1 + $0x284] sm:$0xf]  ;;  %v437_v18 = vperm.slane %v4089_v17, 0  ;;  %v3186_v34 = vld [vmem:[%s4440_s3 + $0xf0] sm:$0xff]  ;;  %s3300_s16 = sshra.s32 %s2121_s27, 4  ;;  %s3301_s16 = int_to_ptr.hbm [resolvable:$true] %s3300_s16 }
  0x58   : > { %1116 = vmatpush.bf16.msra.mxu0 %v2395_v43  ;;  %1070 = vmatmul.bf16.vlgmr.msrb.gmra.mxu1 %v3924_v59  ;;  %v3112_v43 = vld [vmem:[%s4438_s1 + $0x1a4] sm:$0xf]  ;;  %s3302_s26 = scalar_lea.hbm %s3301_s16, 1  ;;  %p3307_p0 = scmp.lt.s32.totalorder %s3301_s16, %s4446_s9 }
  0x59   : > { %1134 = vmatpush.bf16.msra.mxu1 %v2459_v33  ;;  %1088 = vmatmul.bf16.vlgmr.msrb.gmra.mxu2 %v3680_v48  ;;  %v2432_v48 = vld [vmem:[%s4438_s1 + $0x1c8] sm:$0xf0]  ;;  %v2552_v33 = vld [vmem:[%s4438_s1 + $0x2b8] sm:$0xf0]  ;;  %v2419_v61 = vor.u32 %v3112_v43, %v2416_v44  ;;  %v3184_v55 = vld [vmem:[%s4440_s3 + $0xe0] sm:$0xff]  ;;  %p3303_p11 = scmp.ne.s32.totalorder %s3301_s16, %s3302_s26  ;;  %p3308_p1 = scmp.lt.s32.totalorder %s3306_s21, %s3302_s26 }
  0x5a   : > { %1152 = vmatpush.bf16.msra.mxu2 %v2523_v29  ;;  %1106 = vmatmul.bf16.vlgmr.msrb.gmra.mxu3 %v3687_v53  ;;  %v2571_v53 = vor.u32 %v3150_v7, %v2568_v8  ;;  %v2435_v23 = vor.u32 %v3116_v15, %v2432_v48  ;;  %v2424_v29 = vld [vmem:[%s4438_s1 + $0x1b8] sm:$0xf0]  ;;  %v2555_v40 = vor.u32 %v3146_v30, %v2552_v33  ;;  %v2464_v7 = vld [vmem:[%s4438_s1 + $0x208] sm:$0xf0]  ;;  %v3178_v33 = vld [vmem:[%s4440_s3 + $0xb0] sm:$0xff] }
  0x5b   : > { %1170 = vmatpush.bf16.msra.mxu3 %v2587_v46  ;;  %v2427_v37 = vor.u32 %v3114_v28, %v2424_v29  ;;  %v478_v46 = vpack.c.b16 %v466_v31, %v466_v31  ;;  %v2528_v15 = vld [vmem:[%s4438_s1 + $0x288] sm:$0xf0]  ;;  %v3179_v28 = vld [vmem:[%s4440_s3 + $0xb8] sm:$0xff]  ;;  %p3304_p12 = pnand %p3303_p11, %p3438_p5  ;;  %p3309_p2 = por %p3308_p1, %p3307_p0 }
  0x5c   : > { %1117 = vmatpush.bf16.msra.mxu0 %v2387_v63  ;;  %v2344_v63 = vld [vmem:[%s4438_s1 + $0x118] sm:$0xf0]  ;;  %v3177_v43 = vld [vmem:[%s4440_s3 + $0xa8] sm:$0xff] }
  0x5d   : > { %1135 = vmatpush.bf16.msra.mxu1 %v2451_v0  ;;  %v2547_v0 = vor.u32 %v3144_v45, %v2544_v51  ;;  %v2347_v8 = vor.u32 %v3094_v62, %v2344_v63  ;;  %v3187_v29 = vld [vmem:[%s4440_s3 + $0xf8] sm:$0xff]  ;;  %v3185_v44 = vld [vmem:[%s4440_s3 + $0xe8] sm:$0xff]  ;;  %v3176_v51 = vld [vmem:[%s4440_s3 + $0xa0] sm:$0xff]  ;;  %p3305_p13 = pneg %p3304_p12 }
  0x5e   : > { %1153 = vmatpush.bf16.msra.mxu2 %v2515_v50  ;;  %v479_v50 = vpack.c.b16 %v467_v32, %v467_v32  ;;  %v3163_v31 = vld [vmem:[%s4440_s3 + $0x38] sm:$0xff]  ;;  %v3168_v62 = vld [vmem:[%s4440_s3 + $0x60] sm:$0xff] }
  0x5f   : > { %1171 = vmatpush.bf16.msra.mxu3 %v2579_v3  ;;  %v2408_v3 = vld [vmem:[%s4438_s1 + $0x198] sm:$0xf0]  ;;  %p3310_p3 = pnand %p3309_p2, %p3305_p13 }
  0x60   : > { %1118 = vmatpush.bf16.msra.mxu0 %v2379_v12  ;;  %v2411_v9 = vor.u32 %v3110_v2, %v2408_v3  ;;  %v2467_v12 = vor.u32 %v3124_v6, %v2464_v7  ;;  %v3171_v32 = vld [vmem:[%s4440_s3 + $0x78] sm:$0xff]  ;;  %v3182_v6 = vld [vmem:[%s4440_s3 + $0xd0] sm:$0xff] }
  0x61   : > { %1136 = vmatpush.bf16.msra.mxu1 %v2443_v13  ;;  %v2336_v13 = vld [vmem:[%s4438_s1 + $0x108] sm:$0xf0]  ;;  %v3183_v2 = vld [vmem:[%s4440_s3 + $0xd8] sm:$0xff] }
  0x62   : > { %1154 = vmatpush.bf16.msra.mxu2 %v2507_v4  ;;  %v3142_v4 = vld [vmem:[%s4438_s1 + $0x294] sm:$0xf]  ;;  %v2339_v48 = vor.u32 %v3092_v10, %v2336_v13  ;;  %v3159_v3 = vld [vmem:[%s4440_s3 + $0x18] sm:$0xff]  ;;  %v3173_v13 = vld [vmem:[%s4440_s3 + $0x88] sm:$0xff] }
  0x63   : > { %1172 = vmatpush.bf16.msra.mxu3 %v2571_v53  ;;  %v2539_v11 = vor.u32 %v3142_v4, %v2536_v5  ;;  %v3167_v4 = vld [vmem:[%s4440_s3 + $0x58] sm:$0xff]  ;;  %v3174_v5 = vld [vmem:[%s4440_s3 + $0x90] sm:$0xff] }
  0x64   : > { %1119 = vmatpush.bf16.msra.mxu0 %v2371_v22  ;;  %v3166_v10 = vld [vmem:[%s4440_s3 + $0x50] sm:$0xff] }
  0x65   : > { %1137 = vmatpush.bf16.msra.mxu1 %v2435_v23 }
  0x66   : > { %1155 = vmatpush.bf16.msra.mxu2 %v2499_v16  ;;  %v2531_v16 = vor.u32 %v3140_v14, %v2528_v15  ;;  %v3165_v14 = vld [vmem:[%s4440_s3 + $0x48] sm:$0xff]  ;;  %v3172_v15 = vld [vmem:[%s4440_s3 + $0x80] sm:$0xff] }
  0x67   : > { %1173 = vmatpush.bf16.msra.mxu3 %v2563_v26  ;;  %1057 = vmatmul.bf16.gmra.mxu0 %v478_v46 }
  0x68   : > { %1120 = vmatpush.bf16.msra.mxu0 %v2363_v36  ;;  %1075 = vmatmul.bf16.gmra.mxu1 %v479_v50 }
  0x69   : > { %1138 = vmatpush.bf16.msra.mxu1 %v2427_v37  ;;  %1093 = vmatmul.bf16.gmra.mxu2 %v3786_v42  ;;  %v3108_v42 = vld [vmem:[%s4438_s1 + $0x184] sm:$0xf] }
  0x6a   : > { %1156 = vmatpush.bf16.msra.mxu2 %v2491_v27  ;;  %1111 = vmatmul.bf16.gmra.mxu3 %v3797_v47  ;;  %v2400_v47 = vld [vmem:[%s4438_s1 + $0x188] sm:$0xf0] }
  0x6b   : > { %1174 = vmatpush.bf16.msra.mxu3 %v2555_v40  ;;  %v2403_v53 = vor.u32 %v3108_v42, %v2400_v47  ;;  %v3170_v40 = vld [vmem:[%s4440_s3 + $0x70] sm:$0xff]  ;;  %v3181_v42 = vld [vmem:[%s4440_s3 + $0xc8] sm:$0xff] }
  0x6c   : > { %1121 = vmatpush.bf16.msra.mxu0 %v2355_v60  ;;  %v3157_v47 = vld [vmem:[%s4440_s3 + $0x8] sm:$0xff] }
  0x6d   : > { %1139 = vmatpush.bf16.msra.mxu1 %v2419_v61  ;;  %v3160_v61 = vld [vmem:[%s4440_s3 + $0x20] sm:$0xff] }
  0x6e   : > { %1157 = vmatpush.bf16.msra.mxu2 %v2483_v41 }
  0x6f   : > { %1175 = vmatpush.bf16.msra.mxu3 %v2547_v0 }
  0x70   : > { %1122 = vmatpush.bf16.msra.mxu0 %v2347_v8 }
  0x71   : > { %1140 = vmatpush.bf16.msra.mxu1 %v2411_v9  ;;  %v3158_v9 = vld [vmem:[%s4440_s3 + $0x10] sm:$0xff] }
  0x72   : > { %1158 = vmatpush.bf16.msra.mxu2 %v2475_v1  ;;  %v3175_v1 = vld [vmem:[%s4440_s3 + $0x98] sm:$0xff] }
  0x73   : > { %1176 = vmatpush.bf16.msra.mxu3 %v2539_v11 }
  0x74   : > { %1123 = vmatpush.bf16.msra.mxu0 %v2339_v48  ;;  %v3180_v48 = vld [vmem:[%s4440_s3 + $0xc0] sm:$0xff] }
  0x75   : > { %1141 = vmatpush.bf16.msra.mxu1 %v2403_v53  ;;  %v3195_v53 = vld [vmem:[%s4440_s3 + $0x138] sm:$0xff] }
  0x76   : > { %1159 = vmatpush.bf16.msra.mxu2 %v2467_v12 }
  0x77   : > { %1177 = vmatpush.bf16.msra.mxu3 %v2531_v16  ;;  %1124 = vmatmul.bf16.vlgmr.msra.gmra.mxu0 %v3689_v54  ;;  %v3203_v16 = vld [vmem:[%s4440_s3 + $0x178] sm:$0xff] }
  0x78   : > { %1142 = vmatmul.bf16.vlgmr.msra.gmra.mxu1 %v3697_v57  ;;  %1370 = vmatpush.bf16.msrb.mxu0 %v3179_v28 }
  0x79   : > { %1160 = vmatmul.bf16.vlgmr.msra.gmra.mxu2 %v3922_v58  ;;  %1383 = vmatpush.bf16.msrb.mxu1 %v3187_v29 }
  0x7a   : > { %1178 = vmatmul.bf16.vlgmr.msra.gmra.mxu3 %v3924_v59  ;;  %1496 = vmatpush.bf16.msrb.mxu2 %v3163_v31 }
  0x7b   : > { %1509 = vmatpush.bf16.msrb.mxu3 %v3171_v32 }
  0x7c   : > { %1371 = vmatpush.bf16.msrb.mxu0 %v3178_v33  ;;  %v3192_v33 = vld [vmem:[%s4440_s3 + $0x120] sm:$0xff] }
  0x7d   : > { %1384 = vmatpush.bf16.msrb.mxu1 %v3186_v34  ;;  %v3200_v34 = vld [vmem:[%s4440_s3 + $0x160] sm:$0xff] }
  0x7e   : > { %1497 = vmatpush.bf16.msrb.mxu2 %v3162_v39 }
  0x7f   : > { %1510 = vmatpush.bf16.msrb.mxu3 %v3170_v40 }
  0x80   : > { %1372 = vmatpush.bf16.msrb.mxu0 %v3177_v43 }
  0x81   : > { %1385 = vmatpush.bf16.msrb.mxu1 %v3185_v44  ;;  %v3190_v44 = vld [vmem:[%s4440_s3 + $0x110] sm:$0xff] }
  0x84   : > { %1373 = vmatpush.bf16.msrb.mxu0 %v3176_v51 }
  0x85   : > { %1386 = vmatpush.bf16.msrb.mxu1 %v3184_v55 }
  0x87   : > { %1129 = vmatmul.bf16.gmra.mxu0 %v3799_v49 }
  0x88   : > { %1147 = vmatmul.bf16.gmra.mxu1 %v3807_v52  ;;  %1374 = vmatpush.bf16.msrb.mxu0 %v3175_v1  ;;  %v3188_v1 = vld [vmem:[%s4440_s3 + $0x100] sm:$0xff] }
  0x89   : > { %1165 = vmatmul.bf16.gmra.mxu2 %v478_v46  ;;  %v3161_v46 = vld [vmem:[%s4440_s3 + $0x28] sm:$0xff]  ;;  %1387 = vmatpush.bf16.msrb.mxu1 %v3183_v2  ;;  %v3196_v2 = vld [vmem:[%s4440_s3 + $0x140] sm:$0xff] }
  0x8a   : > { %1183 = vmatmul.bf16.gmra.mxu3 %v479_v50  ;;  %v3169_v50 = vld [vmem:[%s4440_s3 + $0x68] sm:$0xff]  ;;  %1498 = vmatpush.bf16.msrb.mxu2 %v3161_v46  ;;  %v3198_v46 = vld [vmem:[%s4440_s3 + $0x150] sm:$0xff] }
  0x8b   : > { %1511 = vmatpush.bf16.msrb.mxu3 %v3169_v50 }
  0x8c   : > { %1375 = vmatpush.bf16.msrb.mxu0 %v3174_v5 }
  0x8d   : > { %1388 = vmatpush.bf16.msrb.mxu1 %v3182_v6 }
  0x8e   : > { %1499 = vmatpush.bf16.msrb.mxu2 %v3160_v61 }
  0x8f   : > { %1512 = vmatpush.bf16.msrb.mxu3 %v3168_v62 }
  0x90   : > { %1376 = vmatpush.bf16.msrb.mxu0 %v3173_v13 }
  0x91   : > { %1389 = vmatpush.bf16.msrb.mxu1 %v3181_v42 }
  0x92   : > { %1500 = vmatpush.bf16.msrb.mxu2 %v3159_v3 }
  0x93   : > { %1513 = vmatpush.bf16.msrb.mxu3 %v3167_v4 }
  0x94   : > { %1377 = vmatpush.bf16.msrb.mxu0 %v3172_v15 }
  0x95   : > { %1390 = vmatpush.bf16.msrb.mxu1 %v3180_v48 }
  0x96   : > { %1501 = vmatpush.bf16.msrb.mxu2 %v3158_v9 }
  0x97   : > { %1514 = vmatpush.bf16.msrb.mxu3 %v3166_v10 }
  0x98   : > { %1660 = vmatpush.bf16.msra.mxu0 %v3195_v53 }
  0x99   : > { %1673 = vmatpush.bf16.msra.mxu1 %v3203_v16 }
  0x9a   : > { %1502 = vmatpush.bf16.msrb.mxu2 %v3157_v47 }
  0x9b   : > { %1515 = vmatpush.bf16.msrb.mxu3 %v3165_v14 }
  0xb4   : > { %v981_v54 = vpop.f32.mrf.mxu0 }
  0xb5   : > { %v982_v19 = vadd.f32 %v981_v54, %v437_v18  ;;  %v999_v57 = vpop.f32.mrf.mxu1 }
  0xb7   : > { %v4092_v20 = vadd.f32 %v999_v57, %v982_v19  ;;  %v3156_v19 = vld [vmem:[%s4440_s3] sm:$0xff] }
  0xb8   : > { %v3164_v57 = vld [vmem:[%s4440_s3 + $0x40] sm:$0xff]  ;;  %1503 = vmatpush.bf16.msrb.mxu2 %v3156_v19 }
  0xb9   : > { %1516 = vmatpush.bf16.msrb.mxu3 %v3164_v57 }
  0xbc   : > { %v4094_v58 = vpop.f32.mrf.mxu2  ;;  %v983_v49 = vpop.f32.mrf.mxu0 }
  0xbd   : > { %v4096_v59 = vpop.f32.mrf.mxu3  ;;  %v984_v52 = vadd.f32 %v983_v49, %v437_v18  ;;  %v1001_v21 = vpop.f32.mrf.mxu1 }
  0xbf   : > { %v4098_v22 = vadd.f32 %v1001_v21, %v984_v52  ;;  %v3194_v21 = vld [vmem:[%s4440_s3 + $0x130] sm:$0xff] }
  0xc0   : > { %1661 = vmatpush.bf16.msra.mxu0 %v3194_v21 }
  0xc4   : > { %v4100_v23 = vpop.f32.mrf.mxu2  ;;  %v986_v25 = vpop.f32.mrf.mxu0 }
  0xc5   : > { %v4102_v24 = vpop.f32.mrf.mxu3  ;;  %v987_v26 = vadd.f32 %v986_v25, %v437_v18  ;;  %v1004_v27 = vpop.f32.mrf.mxu1  ;;  %v3202_v25 = vld [vmem:[%s4440_s3 + $0x170] sm:$0xff] }
  0xc6   : > { %1674 = vmatpush.bf16.msra.mxu1 %v3202_v25 }
  0xc7   : > { %v1005_v30 = vadd.f32 %v1004_v27, %v987_v26  ;;  %v3193_v26 = vld [vmem:[%s4440_s3 + $0x128] sm:$0xff] }
  0xc8   : > { %v3201_v27 = vld [vmem:[%s4440_s3 + $0x168] sm:$0xff]  ;;  %1662 = vmatpush.bf16.msra.mxu0 %v3193_v26 }
  0xca   : > { %1675 = vmatpush.bf16.msra.mxu1 %v3201_v27 }
  0xcc   : > { %v1022_v35 = vpop.f32.mrf.mxu2  ;;  %v988_v38 = vpop.f32.mrf.mxu0  ;;  %1663 = vmatpush.bf16.msra.mxu0 %v3192_v33 }
  0xcd   : > { %v1023_v36 = vadd.f32 %v1022_v35, %v1005_v30  ;;  %v1040_v37 = vpop.f32.mrf.mxu3  ;;  %v1006_v41 = vpop.f32.mrf.mxu1  ;;  %v438_v30 = vperm.slane %v4089_v17, 1  ;;  %v3199_v17 = vld [vmem:[%s4440_s3 + $0x158] sm:$0xff] }
  0xce   : > { %1676 = vmatpush.bf16.msra.mxu1 %v3200_v34 }
  0xcf   : > { %v4134_v45 = vadd.f32 %v1040_v37, %v1023_v36  ;;  %v3191_v36 = vld [vmem:[%s4440_s3 + $0x118] sm:$0xff]  ;;  %v1018_v37 = vadd.f32 %v4094_v58, %v4092_v20  ;;  %v3189_v20 = vld [vmem:[%s4440_s3 + $0x108] sm:$0xff] }
  0xd0   : > { %1664 = vmatpush.bf16.msra.mxu0 %v3191_v36  ;;  %v3197_v58 = vld [vmem:[%s4440_s3 + $0x148] sm:$0xff] }
  0xd1   : > { %v1036_v50 = vadd.f32 %v4096_v59, %v1018_v37 }
  0xd2   : > { %1677 = vmatpush.bf16.msra.mxu1 %v3199_v17 }
  0xd4   : > { %v1024_v56 = vpop.f32.mrf.mxu2  ;;  %v4154_v63 = vpop.f32.mrf.mxu0  ;;  %1665 = vmatpush.bf16.msra.mxu0 %v3190_v44 }
  0xd5   : > { %v1042_v60 = vpop.f32.mrf.mxu3  ;;  %v4156_v0 = vpop.f32.mrf.mxu1  ;;  %v1054_v55 = vadd.f32 %v4154_v63, %v1036_v50 }
  0xd6   : > { %1678 = vmatpush.bf16.msra.mxu1 %v3198_v46  ;;  %v1020_v60 = vadd.f32 %v4100_v23, %v4098_v22 }
  0xd7   : > { %v1072_v3 = vadd.f32 %v4156_v0, %v1054_v55  ;;  %v3211_v55 = vld [vmem:[%s4442_s5 + $0x38] sm:$0xff] }
  0xd8   : > { %1666 = vmatpush.bf16.msra.mxu0 %v3189_v20  ;;  %v1038_v22 = vadd.f32 %v4102_v24, %v1020_v60  ;;  %1841 = vmatpush.bf16.msra.mxu3 %v3211_v55  ;;  %v3219_v60 = vld [vmem:[%s4442_s5 + $0x78] sm:$0xff]  ;;  %v3236_v55 = vld [vmem:[%s4444_s7 + $0x40] sm:$0xff] }
  0xd9   : > { %v1188_v9 = vmax.f32 %v1072_v3, 0.0  ;;  %1780 = vmatpush.bf16.msra.mxu2 %v3219_v60  ;;  %v3217_v3 = vld [vmem:[%s4442_s5 + $0x68] sm:$0xff] }
  0xda   : > { %1679 = vmatpush.bf16.msra.mxu1 %v3197_v58 }
  0xdc   : > { %v1089_v7 = vpop.f32.mrf.mxu2  ;;  %v4182_v11 = vpop.f32.mrf.mxu0  ;;  %1667 = vmatpush.bf16.msra.mxu0 %v3188_v1  ;;  %v3226_v1 = vld [vmem:[%s4442_s5 + $0xb0] sm:$0xff] }
  0xdd   : > { %v1107_v8 = vpop.f32.mrf.mxu3  ;;  %v4184_v12 = vpop.f32.mrf.mxu1  ;;  %v1090_v35 = vadd.f32 %v1089_v7, %v438_v30 }
  0xde   : > { %1680 = vmatpush.bf16.msra.mxu1 %v3196_v2  ;;  %v3208_v2 = vld [vmem:[%s4442_s5 + $0x20] sm:$0xff] }
  0xdf   : > { %v1108_v40 = vadd.f32 %v1107_v8, %v1090_v35  ;;  %v1056_v8 = vadd.f32 %v4182_v11, %v1038_v22  ;;  %v3206_v22 = vld [vmem:[%s4442_s5 + $0x10] sm:$0xff] }
  0xe1   : > { %v1074_v14 = vadd.f32 %v4184_v12, %v1056_v8  ;;  %v3205_v8 = vld [vmem:[%s4442_s5 + $0x8] sm:$0xff] }
  0xe3   : > { %v1190_v25 = vmax.f32 %v1074_v14, 0.0 }
  0xe4   : > { %v1091_v18 = vpop.f32.mrf.mxu2  ;;  %v4216_v49 = vpop.f32.mrf.mxu0 }
  0xe5   : > { %v1109_v54 = vpop.f32.mrf.mxu3  ;;  %v4218_v52 = vpop.f32.mrf.mxu1  ;;  %v1092_v56 = vadd.f32 %v1091_v18, %v438_v30  ;;  %v1059_v26 = vadd.f32 %v4216_v49, %v4134_v45 }
  0xe7   : > { %v1110_v63 = vadd.f32 %v1109_v54, %v1092_v56  ;;  %v3210_v56 = vld [vmem:[%s4442_s5 + $0x30] sm:$0xff] }
  0xe8   : > { %1842 = vmatpush.bf16.msra.mxu3 %v3210_v56 }
  0xec   : > { %v1094_v28 = vpop.f32.mrf.mxu2  ;;  %v1060_v31 = vpop.f32.mrf.mxu0 }
  0xed   : > { %v1112_v29 = vpop.f32.mrf.mxu3  ;;  %v1078_v32 = vpop.f32.mrf.mxu1  ;;  %v1095_v10 = vadd.f32 %v1094_v28, %v438_v30  ;;  %v1077_v31 = vadd.f32 %v4218_v52, %v1059_v26 }
  0xef   : > { %v1113_v48 = vadd.f32 %v1112_v29, %v1095_v10  ;;  %v3222_v10 = vld [vmem:[%s4442_s5 + $0x90] sm:$0xff] }
  0xf4   : > { %v1096_v38 = vpop.f32.mrf.mxu2  ;;  %v1125_v41 = vpop.f32.mrf.mxu0 }
  0xf5   : > { %v1114_v39 = vpop.f32.mrf.mxu3  ;;  %v1143_v43 = vpop.f32.mrf.mxu1  ;;  %v1126_v51 = vadd.f32 %v1125_v41, %v1108_v40 }
  0xf6   : > { %v1192_v39 = vmax.f32 %v1077_v31, 0.0 }
  0xf7   : > { %v1144_v61 = vadd.f32 %v1143_v43, %v1126_v51 }
  0xfc   : > { %v1161_v62 = vpop.f32.mrf.mxu2  ;;  %v1127_v5 = vpop.f32.mrf.mxu0 }
  0xfd   : > { %v1179_v59 = vpop.f32.mrf.mxu3  ;;  %v1162_v4 = vadd.f32 %v1161_v62, %v1144_v61  ;;  %v1145_v6 = vpop.f32.mrf.mxu1  ;;  %v1128_v7 = vadd.f32 %v1127_v5, %v1110_v63  ;;  %v3227_v61 = vld [vmem:[%s4442_s5 + $0xb8] sm:$0xff]  ;;  %v3209_v62 = vld [vmem:[%s4442_s5 + $0x28] sm:$0xff]  ;;  %v3216_v5 = vld [vmem:[%s4442_s5 + $0x60] sm:$0xff] }
  0xfe   : > { %1843 = vmatpush.bf16.msra.mxu3 %v3209_v62  ;;  %v3225_v63 = vld [vmem:[%s4442_s5 + $0xa8] sm:$0xff] }
  0xff   : > { %v1180_v23 = vadd.f32 %v1179_v59, %v1162_v4  ;;  %v1146_v47 = vadd.f32 %v1145_v6, %v1128_v7  ;;  %v3218_v59 = vld [vmem:[%s4442_s5 + $0x70] sm:$0xff]  ;;  %v3207_v4 = vld [vmem:[%s4442_s5 + $0x18] sm:$0xff]  ;;  %v3224_v6 = vld [vmem:[%s4442_s5 + $0xa0] sm:$0xff] }
 0x100   : > { %1781 = vmatpush.bf16.msra.mxu2 %v3218_v59  ;;  %v3223_v7 = vld [vmem:[%s4442_s5 + $0x98] sm:$0xff]  ;;  %v3285_v59 = vld [vmem:[%s4443_s6] ss:$0 sm:$0xff] }
 0x101   : > { %v1189_v13 = vmax.f32 %v1180_v23, 0.0  ;;  %v3215_v23 = vld [vmem:[%s4442_s5 + $0x58] sm:$0xff] }
 0x102   : > { %1844 = vmatpush.bf16.msra.mxu3 %v3208_v2 }
 0x103   : > { %v1194_v42 = vpack.c.bf16 %v1189_v13, %v1188_v9  ;;  %v3214_v9 = vld [vmem:[%s4442_s5 + $0x50] sm:$0xff]  ;;  %v3204_v13 = vld [vmem:[%s4442_s5] sm:$0xff] }
 0x104   : > { %v1163_v0 = vpop.f32.mrf.mxu2  ;;  %v1130_v24 = vpop.f32.mrf.mxu0  ;;  %1782 = vmatpush.bf16.msra.mxu2 %v3217_v3 }
 0x105   : > { %v1181_v15 = vpop.f32.mrf.mxu3  ;;  %v1264_v53 = vunpack.c.l.b16 %v1194_v42  ;;  %v1265_v16 = vunpack.c.h.b16 %v1194_v42  ;;  %v1164_v18 = vadd.f32 %v1163_v0, %v1146_v47  ;;  %v1148_v54 = vpop.f32.mrf.mxu1  ;;  %v1131_v21 = vadd.f32 %v1130_v24, %v1113_v48  ;;  %v3213_v42 = vld [vmem:[%s4442_s5 + $0x48] sm:$0xff]  ;;  %v3220_v48 = vld [vmem:[%s4442_s5 + $0x80] sm:$0xff]  ;;  %v3243_v24 = vld [vmem:[%s4444_s7 + $0x78] sm:$0xff] }
 0x106   : > { %1845 = vmatpush.bf16.msra.mxu3 %v3207_v4  ;;  %v3221_v47 = vld [vmem:[%s4442_s5 + $0x88] sm:$0xff] }
 0x107   : > { %v1396_v19 = vpack.c.b16 %v1264_v53, %v1264_v53  ;;  %v1397_v57 = vpack.c.b16 %v1265_v16, %v1265_v16  ;;  %v1182_v11 = vadd.f32 %v1181_v15, %v1164_v18  ;;  %v1149_v28 = vadd.f32 %v1148_v54, %v1131_v21  ;;  %v3212_v15 = vld [vmem:[%s4442_s5 + $0x40] sm:$0xff]  ;;  %v3235_v18 = vld [vmem:[%s4444_s7 + $0x38] sm:$0xff]  ;;  %v3234_v54 = vld [vmem:[%s4444_s7 + $0x30] sm:$0xff] }
 0x108   : > { %1783 = vmatpush.bf16.msra.mxu2 %v3216_v5  ;;  %v3233_v21 = vld [vmem:[%s4444_s7 + $0x28] sm:$0xff] }
 0x109   : > { %v1191_v27 = vmax.f32 %v1182_v11, 0.0  ;;  %1504 = vmatmul.bf16.vlgmr.msrb.gmra.mxu2 %v1396_v19  ;;  %1517 = vmatmul.bf16.vlgmr.msrb.gmra.mxu3 %v1397_v57  ;;  %v3242_v19 = vld [vmem:[%s4444_s7 + $0x70] sm:$0xff] }
 0x10a   : > { %1846 = vmatpush.bf16.msra.mxu3 %v3206_v22 }
 0x10b   : > { %v1195_v12 = vpack.c.bf16 %v1191_v27, %v1190_v25 }
 0x10c   : > { %v1166_v30 = vpop.f32.mrf.mxu2  ;;  %v1132_v35 = vpop.f32.mrf.mxu0  ;;  %1784 = vmatpush.bf16.msra.mxu2 %v3215_v23 }
 0x10d   : > { %v1184_v29 = vpop.f32.mrf.mxu3  ;;  %v1266_v32 = vunpack.c.l.b16 %v1195_v12  ;;  %v1267_v33 = vunpack.c.h.b16 %v1195_v12  ;;  %v1167_v34 = vadd.f32 %v1166_v30, %v1149_v28  ;;  %v1150_v36 = vpop.f32.mrf.mxu1  ;;  %v3232_v12 = vld [vmem:[%s4444_s7 + $0x20] sm:$0xff] }
 0x10e   : > { %1847 = vmatpush.bf16.msra.mxu3 %v3205_v8 }
 0x10f   : > { %v1268_v17 = vpack.c.b16 %v1266_v32, %v1264_v53  ;;  %v1269_v37 = vpack.c.b16 %v1267_v33, %v1265_v16  ;;  %v1185_v38 = vadd.f32 %v1184_v29, %v1167_v34 }
 0x110   : > { %1785 = vmatpush.bf16.msra.mxu2 %v3214_v9 }
 0x111   : > { %v1193_v40 = vmax.f32 %v1185_v38, 0.0  ;;  %v1270_v45 = vrot.slane %v1268_v17, 3  ;;  %v1271_v49 = vrot.slane %v1269_v37, 3 }
 0x112   : > { %1848 = vmatpush.bf16.msra.mxu3 %v3204_v13 }
 0x113   : > { %v1196_v41 = vpack.c.bf16 %v1193_v40, %v1192_v39  ;;  %1378 = vmatmul.bf16.vlgmr.msrb.gmra.mxu0 %v1270_v45  ;;  %1391 = vmatmul.bf16.vlgmr.msrb.gmra.mxu1 %v1271_v49 }
 0x114   : > { %v1168_v43 = vpop.f32.mrf.mxu2  ;;  %1921 = vmatpush.bf16.msrb.mxu0 %v3227_v61  ;;  %1786 = vmatpush.bf16.msra.mxu2 %v3213_v42 }
 0x115   : > { %v1186_v44 = vpop.f32.mrf.mxu3  ;;  %v1556_v46 = vunpack.c.l.b16 %v1196_v41  ;;  %v1557_v50 = vunpack.c.h.b16 %v1196_v41  ;;  %2030 = vmatpush.bf16.msrb.mxu1 %v3243_v24  ;;  %v3241_v41 = vld [vmem:[%s4444_s7 + $0x68] sm:$0xff]  ;;  %v3231_v43 = vld [vmem:[%s4444_s7 + $0x18] sm:$0xff] }
 0x116   : > { %v3240_v44 = vld [vmem:[%s4444_s7 + $0x60] sm:$0xff] }
 0x117   : > { %v1558_v52 = vpack.c.b16 %v1556_v46, %v1266_v32  ;;  %v1559_v51 = vpack.c.b16 %v1557_v50, %v1267_v33  ;;  %v3284_v33 = vld [vmem:[%s4441_s4] ss:$0 sm:$0xff]  ;;  %v3230_v46 = vld [vmem:[%s4444_s7 + $0x10] sm:$0xff]  ;;  %v3239_v50 = vld [vmem:[%s4444_s7 + $0x58] sm:$0xff] }
 0x118   : > { %1922 = vmatpush.bf16.msrb.mxu0 %v3226_v1  ;;  %1787 = vmatpush.bf16.msra.mxu2 %v3212_v15 }
 0x119   : > { %v1560_v20 = vrot.slane %v1558_v52, 2  ;;  %v1561_v58 = vrot.slane %v1559_v51, 2  ;;  %2031 = vmatpush.bf16.msrb.mxu1 %v3242_v19  ;;  %v3229_v52 = vld [vmem:[%s4444_s7 + $0x8] sm:$0xff]  ;;  %v3238_v51 = vld [vmem:[%s4444_s7 + $0x50] sm:$0xff] }
 0x11c   : > { %1923 = vmatpush.bf16.msrb.mxu0 %v3225_v63  ;;  %2091 = vmatpush.bf16.msrb.mxu2 %v3235_v18 }
 0x11d   : > { %2032 = vmatpush.bf16.msrb.mxu1 %v3241_v41 }
 0x120   : > { %1924 = vmatpush.bf16.msrb.mxu0 %v3224_v6  ;;  %2092 = vmatpush.bf16.msrb.mxu2 %v3234_v54 }
 0x121   : > { %2033 = vmatpush.bf16.msrb.mxu1 %v3240_v44 }
 0x123   : > { %1668 = vmatmul.bf16.vlgmr.msra.gmra.mxu0 %v1560_v20  ;;  %1681 = vmatmul.bf16.vlgmr.msra.gmra.mxu1 %v1561_v58  ;;  %v3228_v20 = vld [vmem:[%s4444_s7] sm:$0xff]  ;;  %v3237_v58 = vld [vmem:[%s4444_s7 + $0x48] sm:$0xff] }
 0x124   : > { %1925 = vmatpush.bf16.msrb.mxu0 %v3223_v7  ;;  %2093 = vmatpush.bf16.msrb.mxu2 %v3233_v21 }
 0x125   : > { %2034 = vmatpush.bf16.msrb.mxu1 %v3239_v50 }
 0x128   : > { %1926 = vmatpush.bf16.msrb.mxu0 %v3222_v10  ;;  %2094 = vmatpush.bf16.msrb.mxu2 %v3232_v12  ;;  %v2104_v10 = vld [vmem:[%s4445_s8] sm:$0x1] }
 0x129   : > { %2035 = vmatpush.bf16.msrb.mxu1 %v3238_v51 }
 0x12c   : > { %1927 = vmatpush.bf16.msrb.mxu0 %v3221_v47  ;;  %2095 = vmatpush.bf16.msrb.mxu2 %v3231_v43 }
 0x12d   : > { %2036 = vmatpush.bf16.msrb.mxu1 %v3237_v58 }
 0x130   : > { %1928 = vmatpush.bf16.msrb.mxu0 %v3220_v48  ;;  %2096 = vmatpush.bf16.msrb.mxu2 %v3230_v46 }
 0x131   : > { %2037 = vmatpush.bf16.msrb.mxu1 %v3236_v55 }
 0x134   : > { %2097 = vmatpush.bf16.msrb.mxu2 %v3229_v52 }
 0x138   : > { %2098 = vmatpush.bf16.msrb.mxu2 %v3228_v20 }
 0x18c   : > { %v1505_v14 = vpop.f32.mrf.mxu2  ;;  %v1518_v0 = vpop.f32.mrf.mxu3 }
 0x190   : > { %v1379_v53 = vpop.f32.mrf.mxu0  ;;  %v1392_v16 = vpop.f32.mrf.mxu1 }
 0x191   : > { %v1393_v27 = vadd.f32 %v1392_v16, %v1379_v53 }
 0x193   : > { %v1506_v28 = vadd.f32 %v1505_v14, %v1393_v27 }
 0x194   : > { %v1507_v57 = vpop.f32.mrf.mxu2  ;;  %v1520_v11 = vpop.f32.mrf.mxu3 }
 0x195   : > { %v1519_v31 = vadd.f32 %v1518_v0, %v1506_v28 }
 0x198   : > { %v1381_v25 = vpop.f32.mrf.mxu0  ;;  %v1394_v26 = vpop.f32.mrf.mxu1 }
 0x1a0   : > { %v1669_v30 = vpop.f32.mrf.mxu0  ;;  %v1682_v29 = vpop.f32.mrf.mxu1 }
 0x1a1   : > { %v1683_v32 = vadd.f32 %v1682_v29, %v1669_v30 }
 0x1a3   : > { %v1686_v34 = vadd.f32 %v1683_v32, %v1519_v31 }
 0x1a5   : > { %v1691_v35 = vadd.f32 %v3284_v33, %v1686_v34 }
 0x1a7   : > { %v1692_v36 = vmax.f32 %v1691_v35, 0.0 }
 0x1a8   : > { %v1671_v17 = vpop.f32.mrf.mxu0  ;;  %v1684_v37 = vpop.f32.mrf.mxu1 }
 0x1a9   : > { %v1693_v38 = vpack.c.bf16 %v1692_v36, %v1692_v36 }
 0x1ab   : > { %v1728_v39 = vunpack.c.l.b16 %v1693_v38  ;;  %1849 = vmatmul.bf16.vlgmr.msra.gmra.mxu3 %v1693_v38 }
 0x1ad   : > { %v1729_v40 = vpack.c.b16 %v1728_v39, %v1728_v39 }
 0x1af   : > { %v1730_v45 = vrot.slane %v1729_v40, 1  ;;  %v1871_v49 = vrot.slane %v1729_v40, 2 }
 0x1b1   : > { %1788 = vmatmul.bf16.vlgmr.msra.gmra.mxu2 %v1730_v45  ;;  %1929 = vmatmul.bf16.vlgmr.msrb.gmra.mxu0 %v1871_v49 }
 0x22e   : > { %v1850_v56 = vpop.f32.mrf.mxu3  ;;  %v1930_v60 = vpop.f32.mrf.mxu0 }
 0x234   : > { %v1789_v61 = vpop.f32.mrf.mxu2 }
 0x235   : > { %v1851_v62 = vadd.f32 %v1850_v56, %v1789_v61 }
 0x236   : > { %v1852_v1 = vpop.f32.mrf.mxu3  ;;  %v1932_v2 = vpop.f32.mrf.mxu0 }
 0x237   : > { %v1934_v3 = vadd.f32 %v1930_v60, %v1851_v62 }
 0x239   : > { %v1939_v63 = vadd.f32 %v3285_v59, %v1934_v3 }
 0x23b   : > { %v1940_v4 = vmax.f32 %v1939_v63, 0.0 }
 0x23c   : > { %v1791_v5 = vpop.f32.mrf.mxu2 }
 0x23d   : > { %v1941_v6 = vpack.c.bf16 %v1940_v4, %v1940_v4 }
 0x23f   : > { %v1976_v22 = vunpack.c.l.b16 %v1941_v6  ;;  %2099 = vmatmul.bf16.vlgmr.msrb.gmra.mxu2 %v1941_v6 }
 0x241   : > { %v1977_v23 = vpack.c.b16 %v1976_v22, %v1976_v22 }
 0x243   : > { %v1979_v7 = vshrl.u32 %v1977_v23, 16 }
 0x245   : > { %2038 = vmatmul.bf16.vlgmr.msrb.gmra.mxu1 %v1979_v7 }
 0x2c2   : > { %v2039_v8 = vpop.f32.mrf.mxu1  ;;  %v2100_v9 = vpop.f32.mrf.mxu2 }
 0x2c3   : > { %v2101_v13 = vadd.f32 %v2100_v9, %v2039_v8 }
 0x2c5   : > { %v2105_v42 = vadd.f32 %v2104_v10, %v2101_v13 }
 0x2c7   : > { %2106 = vst [vmem:[%s324_s25] sm:$0x1] %v2105_v42 }
 0x2c8   : > { %3313 = shalt.err (!%p3310_p3)
}
 0x2c9   : > { %3245 = dma.vmem_to_hbm [thread:$0]  (%p3438_p5), %s2119_s29, 16, %s2121_s27, %s2108_s14  }
 0x2ca   : > { %v2041_v47 = vpop.f32.mrf.mxu1  ;;  %v2102_v14 = vpop.f32.mrf.mxu2 }
 0x2cb PF: > { %p3251_p4 = scmp.ge.s32.totalorder %s3348_s12, 2  ;;  %s2132_s17 = sand.u32 1, %s3336_s30  }
 0x2cc   : > { %s2133_s28 = scalar_lea.sflag [#allocation3], %s2132_s17 }
 0x2cd   : > { %p3248_p7 = pnand %p3251_p4, %p3442_p6 }
 0x2cf   : > { %p3249_p8 = pneg %p3248_p7 }
 0x2d1   : > { %3331 = dma.done.wait (%p3249_p8), %s2133_s28, 16  }
 0x2d2   : > { %3333 = vsyncadd (%p3249_p8), %s2133_s28, 4294967280  ;;  %p19_p5 = scmp.ge.s32.totalorder %s3425_s15, 4   ;;  %s4451_s30 = smov %s3340_s10 }
 0x2d3   : > { %s4452_s10 = smov %s3344_s11  ;;  %s4453_s11 = smov %s3436_s18 }
 0x2d4   : > { %s4454_s12 = smov %s3425_s15  ;;  %21 = sbr.rel (!%p19_p5) target bundleno = 5 (0x5), region = 96 }
 0x2d9   :  { %2138 = vsyncpa [#allocation3], 1 }
 0x2da   :  { %2140 = vsyncpa [#allocation3 + $0x1], 1 }

</bundles_post_ra>
